<compile_context>
chip_gen: v5e
topology: v5e:2x2
jax: 0.10.0
libtpu: 0.0.40
codegen_flags: <defaults>
</compile_context>

<pallas_src>
import math

import jax
import jax.numpy as jnp
from jax.experimental import pallas as pl
from jax.experimental.pallas import tpu as pltpu


def _round_up(v, m):
    return ((v + m - 1) // m) * m


def _make_fused_kernel(H, W, cins, cpads, pad):
    """Builds the fused 4-layer conv kernel for one (C, H*W) image."""
    HW = H * W
    # Flat offset of tap (dy, dx) relative to the center pixel.
    offsets = [(dy - 1) * W + (dx - 1) for dy in range(3) for dx in range(3)]

    def kernel(alpha_ref, edge_ref, x_ref,
               w1_ref, b1_ref, w2_ref, b2_ref, w3_ref, b3_ref, w4_ref, b4_ref,
               o_ref, a_scr, p_scr):
        mask_l = edge_ref[0:1, :]   # zeros where x == 0      (kills dx==0 wrap)
        mask_r = edge_ref[1:2, :]   # zeros where x == W - 1  (kills dx==2 wrap)

        # Zero the flat-padded activation buffer once per image.  This supplies
        # the 'same'-conv zero border (columns outside [pad, pad+HW)) and the
        # zero rows used when Cin is padded up to a multiple of 8.
        a_scr[...] = jnp.zeros(a_scr.shape, a_scr.dtype)

        def conv3x3(act, cin, cpad, w_ref, b_ref):
            # act: (cin, HW) f32, lane-dense (spatial on the lane axis).
            # Lane-aligned write into the center of the padded scratch.
            a_scr[0:cin, pad:pad + HW] = act
            # Stage the im2col patch matrix (9*cpad, HW) in VMEM scratch.
            # Rows [cin, cpad) of each tap come out zero automatically because
            # a_scr was pre-zeroed and only rows [0, cin) were written.
            for t, off in enumerate(offsets):
                dx = t % 3
                tap = a_scr[0:cpad, pad + off:pad + off + HW]
                if dx == 0:
                    tap = tap * mask_l
                elif dx == 2:
                    tap = tap * mask_r
                p_scr[t * cpad:(t + 1) * cpad, :] = tap
            # One deep-K MXU matmul per layer: (cout, 9*cpad) @ (9*cpad, HW).
            z = jnp.dot(w_ref[...], p_scr[0:9 * cpad, :],
                        preferred_element_type=jnp.float32)
            return z + b_ref[...]           # bias broadcasts over the lane dim

        def prelu(z, a):
            return jnp.where(z >= 0.0, z, a * z)

        act = x_ref[0]                                                  # (Cin, HW)
        act = prelu(conv3x3(act, cins[0], cpads[0], w1_ref, b1_ref), alpha_ref[0])
        act = prelu(conv3x3(act, cins[1], cpads[1], w2_ref, b2_ref), alpha_ref[1])
        act = prelu(conv3x3(act, cins[2], cpads[2], w3_ref, b3_ref), alpha_ref[2])
        act = jnp.tanh(conv3x3(act, cins[3], cpads[3], w4_ref, b4_ref))  # (1, HW)
        o_ref[0] = act

    return kernel


def _pack_weight(w_hwio, cpad):
    """(3,3,cin,cout) HWIO -> (cout, 9*cpad); column = (dy*3+dx)*cpad + ci."""
    kh, kw, cin, cout = w_hwio.shape
    w = jnp.transpose(w_hwio, (3, 0, 1, 2))                  # (cout, 3, 3, cin)
    if cpad != cin:
        w = jnp.pad(w, ((0, 0), (0, 0), (0, 0), (0, cpad - cin)))
    return w.reshape(cout, kh * kw * cpad).astype(jnp.float32)


def transfusion_conv_module(x_nchw, params, prelu_alphas):
    """Fused 4-layer conv stack (conv3x3+PReLU x3, conv3x3+Tanh). NCHW in/out."""
    N, Cin, H, W = x_nchw.shape
    HW = H * W
    cins = [w.shape[2] for (w, _) in params]                 # [Cin, 16, 32, 16]
    assert cins[0] == Cin
    cpads = [_round_up(max(c, 8), 8) for c in cins]
    pad = _round_up(W + 1, 128)      # flat pad, 128-aligned center -> aligned act writes
    a_rows = _round_up(max(cins + cpads), 8)
    p_rows = 9 * max(cpads)

    x_flat = x_nchw.reshape(N, Cin, HW).astype(jnp.float32)
    alphas = jnp.asarray(prelu_alphas, jnp.float32)          # (3,) -> SMEM

    # Column-edge masks: kill the horizontal row-wrap of the flattened H*W
    # layout for the dx=0 / dx=2 taps (vertical OOB lands in the zero border).
    col = jnp.arange(HW, dtype=jnp.int32) % W
    edge = jnp.stack([(col > 0), (col < W - 1)]).astype(jnp.float32)   # (2, HW)

    w_aug, b_aug = [], []
    for (w, b), cpad in zip(params, cpads):
        w_aug.append(_pack_weight(w, cpad))
        b_aug.append(b.reshape(-1, 1).astype(jnp.float32))   # (cout, 1)

    const2d = lambda n: (0, 0)
    wb_specs = []
    for wk, bk in zip(w_aug, b_aug):
        wb_specs.append(pl.BlockSpec(wk.shape, const2d))
        wb_specs.append(pl.BlockSpec(bk.shape, const2d))

    kernel = _make_fused_kernel(H, W, cins, cpads, pad)
    out = pl.pallas_call(
        kernel,
        out_shape=jax.ShapeDtypeStruct((N, 1, HW), jnp.float32),
        grid=(N,),
        in_specs=[
            pl.BlockSpec(memory_space=pltpu.MemorySpace.SMEM),   # PReLU slopes
            pl.BlockSpec(edge.shape, const2d),                   # edge masks
            pl.BlockSpec((1, Cin, HW), lambda n: (n, 0, 0)),     # input image
        ] + wb_specs,
        out_specs=pl.BlockSpec((1, 1, HW), lambda n: (n, 0, 0)),
        scratch_shapes=[
            pltpu.VMEM((a_rows, HW + 2 * pad), jnp.float32),     # padded act
            pltpu.VMEM((p_rows, HW), jnp.float32),               # im2col patches
        ],
        compiler_params=pltpu.CompilerParams(
            dimension_semantics=("parallel",)),
    )(alphas, edge, x_flat, *[a for pair in zip(w_aug, b_aug) for a in pair])
    return out.reshape(N, 1, H, W)


def init_params(key, in_channels):
    """Matches the PyTorch init: w ~ N(0, sqrt(2/(3*3*cout))), b = 0,
    nn.PReLU() default single shared slope 0.25 per layer."""
    layer_chans = [(in_channels, 16), (16, 32), (32, 16), (16, 1)]
    params = []
    for cin, cout in layer_chans:
        key, kw = jax.random.split(key)
        n = 3 * 3 * cout
        w = jax.random.normal(kw, (3, 3, cin, cout), jnp.float32) * math.sqrt(2.0 / n)
        b = jnp.zeros((cout,), jnp.float32)
        params.append((w, b))
    return params, (0.25, 0.25, 0.25)


def reference_forward(x_nchw, params, prelu_alphas):
    """Pure-JAX reference (lax conv) for the correctness check."""
    x = x_nchw.astype(jnp.float32)
    for i, (w, b) in enumerate(params):
        y = jax.lax.conv_general_dilated(
            x, w, window_strides=(1, 1), padding="SAME",
            dimension_numbers=("NCHW", "HWIO", "NCHW"),
            precision=jax.lax.Precision.HIGHEST)
        y = y + b.reshape(1, -1, 1, 1)
        if i < 3:
            y = jnp.where(y >= 0, y, prelu_alphas[i] * y)
        else:
            y = jnp.tanh(y)
        x = y
    return x


if __name__ == "__main__":
    key = jax.random.PRNGKey(0)
    key, kx = jax.random.split(key)
    # Transfusion15's conv_module2 sees a 4-channel NCHW map (cat of decoder
    # output, previous stage output and the 2-channel source); small spatial.
    x = jax.random.normal(kx, (2, 4, 16, 16), jnp.float32)
    params, prelu_alphas = init_params(key, in_channels=4)

    out = jax.block_until_ready(transfusion_conv_module(x, params, prelu_alphas))
    ref = jax.block_until_ready(reference_forward(x, params, prelu_alphas))

    assert out.shape == (2, 1, 16, 16)
    assert jnp.allclose(out, ref, atol=2e-4, rtol=2e-4), (
        "mismatch vs JAX reference: max abs err = "
        f"{float(jnp.max(jnp.abs(out - ref)))}")
    print("KERNEL_OK")
</pallas_src>

<mosaic_0001>
module attributes {stable_mosaic.version = 11 : i64} {
  func.func @kernel(%arg0: i32, %arg1: memref<3xf32, #tpu.memory_space<smem>>, %arg2: memref<2x256xf32, #tpu.memory_space<vmem>>, %arg3: memref<1x4x256xf32, #tpu.memory_space<vmem>>, %arg4: memref<16x72xf32, #tpu.memory_space<vmem>>, %arg5: memref<16x1xf32, #tpu.memory_space<vmem>>, %arg6: memref<32x144xf32, #tpu.memory_space<vmem>>, %arg7: memref<32x1xf32, #tpu.memory_space<vmem>>, %arg8: memref<16x288xf32, #tpu.memory_space<vmem>>, %arg9: memref<16x1xf32, #tpu.memory_space<vmem>>, %arg10: memref<1x144xf32, #tpu.memory_space<vmem>>, %arg11: memref<1x1xf32, #tpu.memory_space<vmem>>, %arg12: memref<1x1x256xf32, #tpu.memory_space<vmem>>, %arg13: memref<32x512xf32, #tpu.memory_space<vmem>>, %arg14: memref<288x256xf32, #tpu.memory_space<vmem>>) attributes {dimension_semantics = [#tpu.dimension_semantics<parallel>], iteration_bounds = array<i64: 2>, scalar_prefetch = 0 : i64, scratch_operands = 2 : i64, tpu.core_type = #tpu.core_type<tc>, window_params = [{transform_indices = @transform_0, window_bounds = array<i64: 3>}, {pipeline_mode = #tpu.pipeline_mode<synchronous>, transform_indices = @transform_1, window_bounds = array<i64: 2, 256>}, {transform_indices = @transform_2, window_bounds = array<i64: 1, 4, 256>}, {pipeline_mode = #tpu.pipeline_mode<synchronous>, transform_indices = @transform_3, window_bounds = array<i64: 16, 72>}, {pipeline_mode = #tpu.pipeline_mode<synchronous>, transform_indices = @transform_4, window_bounds = array<i64: 16, 1>}, {pipeline_mode = #tpu.pipeline_mode<synchronous>, transform_indices = @transform_5, window_bounds = array<i64: 32, 144>}, {pipeline_mode = #tpu.pipeline_mode<synchronous>, transform_indices = @transform_6, window_bounds = array<i64: 32, 1>}, {pipeline_mode = #tpu.pipeline_mode<synchronous>, transform_indices = @transform_7, window_bounds = array<i64: 16, 288>}, {pipeline_mode = #tpu.pipeline_mode<synchronous>, transform_indices = @transform_8, window_bounds = array<i64: 16, 1>}, {pipeline_mode = #tpu.pipeline_mode<synchronous>, transform_indices = @transform_9, window_bounds = array<i64: 1, 144>}, {pipeline_mode = #tpu.pipeline_mode<synchronous>, transform_indices = @transform_10, window_bounds = array<i64: 1, 1>}, {transform_indices = @transform_11, window_bounds = array<i64: 1, 1, 256>}]} {
    %c0 = arith.constant 0 : index
    %c0_0 = arith.constant 0 : index
    %0 = vector.load %arg2[%c0, %c0_0] : memref<2x256xf32, #tpu.memory_space<vmem>>, vector<1x256xf32>
    %c1 = arith.constant 1 : index
    %c0_1 = arith.constant 0 : index
    %1 = vector.load %arg2[%c1, %c0_1] : memref<2x256xf32, #tpu.memory_space<vmem>>, vector<1x256xf32>
    %cst = arith.constant 0.000000e+00 : f32
    %2 = vector.broadcast %cst : f32 to vector<32x512xf32>
    %c0_2 = arith.constant 0 : index
    %c0_3 = arith.constant 0 : index
    %3 = vector.load %arg13[%c0_2, %c0_3] : memref<32x512xf32, #tpu.memory_space<vmem>>, vector<32x512xf32>
    tpu.vector_store %arg13[%c0_2, %c0_3], %2 {strides = array<i32>} : memref<32x512xf32, #tpu.memory_space<vmem>>, vector<32x512xf32>,
    %c0_4 = arith.constant 0 : index
    %c0_5 = arith.constant 0 : index
    %c0_6 = arith.constant 0 : index
    %4 = vector.load %arg3[%c0_4, %c0_5, %c0_6] : memref<1x4x256xf32, #tpu.memory_space<vmem>>, vector<1x4x256xf32>
    %5 = vector.shape_cast %4 : vector<1x4x256xf32> to vector<4x256xf32>
    %c0_7 = arith.constant 0 : index
    %c128 = arith.constant 128 : index
    %6 = vector.load %arg13[%c0_7, %c128] : memref<32x512xf32, #tpu.memory_space<vmem>>, vector<4x256xf32>
    tpu.vector_store %arg13[%c0_7, %c128], %5 {strides = array<i32>} : memref<32x512xf32, #tpu.memory_space<vmem>>, vector<4x256xf32>,
    %c0_8 = arith.constant 0 : index
    %c111 = arith.constant 111 : index
    %7 = vector.load %arg13[%c0_8, %c111] : memref<32x512xf32, #tpu.memory_space<vmem>>, vector<8x256xf32>
    %8 = vector.broadcast %0 : vector<1x256xf32> to vector<8x256xf32>
    %9 = arith.mulf %7, %8 : vector<8x256xf32>
    %c0_9 = arith.constant 0 : index
    %c0_10 = arith.constant 0 : index
    %10 = vector.load %arg14[%c0_9, %c0_10] : memref<288x256xf32, #tpu.memory_space<vmem>>, vector<8x256xf32>
    tpu.vector_store %arg14[%c0_9, %c0_10], %9 {strides = array<i32>} : memref<288x256xf32, #tpu.memory_space<vmem>>, vector<8x256xf32>,
    %c0_11 = arith.constant 0 : index
    %c112 = arith.constant 112 : index
    %11 = vector.load %arg13[%c0_11, %c112] : memref<32x512xf32, #tpu.memory_space<vmem>>, vector<8x256xf32>
    %c8 = arith.constant 8 : index
    %c0_12 = arith.constant 0 : index
    %12 = vector.load %arg14[%c8, %c0_12] : memref<288x256xf32, #tpu.memory_space<vmem>>, vector<8x256xf32>
    tpu.vector_store %arg14[%c8, %c0_12], %11 {strides = array<i32>} : memref<288x256xf32, #tpu.memory_space<vmem>>, vector<8x256xf32>,
    %c0_13 = arith.constant 0 : index
    %c113 = arith.constant 113 : index
    %13 = vector.load %arg13[%c0_13, %c113] : memref<32x512xf32, #tpu.memory_space<vmem>>, vector<8x256xf32>
    %14 = vector.broadcast %1 : vector<1x256xf32> to vector<8x256xf32>
    %15 = arith.mulf %13, %14 : vector<8x256xf32>
    %c16 = arith.constant 16 : index
    %c0_14 = arith.constant 0 : index
    %16 = vector.load %arg14[%c16, %c0_14] : memref<288x256xf32, #tpu.memory_space<vmem>>, vector<8x256xf32>
    tpu.vector_store %arg14[%c16, %c0_14], %15 {strides = array<i32>} : memref<288x256xf32, #tpu.memory_space<vmem>>, vector<8x256xf32>,
    %c0_15 = arith.constant 0 : index
    %c127 = arith.constant 127 : index
    %17 = vector.load %arg13[%c0_15, %c127] : memref<32x512xf32, #tpu.memory_space<vmem>>, vector<8x256xf32>
    %18 = vector.broadcast %0 : vector<1x256xf32> to vector<8x256xf32>
    %19 = arith.mulf %17, %18 : vector<8x256xf32>
    %c24 = arith.constant 24 : index
    %c0_16 = arith.constant 0 : index
    %20 = vector.load %arg14[%c24, %c0_16] : memref<288x256xf32, #tpu.memory_space<vmem>>, vector<8x256xf32>
    tpu.vector_store %arg14[%c24, %c0_16], %19 {strides = array<i32>} : memref<288x256xf32, #tpu.memory_space<vmem>>, vector<8x256xf32>,
    %c0_17 = arith.constant 0 : index
    %c128_18 = arith.constant 128 : index
    %21 = vector.load %arg13[%c0_17, %c128_18] : memref<32x512xf32, #tpu.memory_space<vmem>>, vector<8x256xf32>
    %c32 = arith.constant 32 : index
    %c0_19 = arith.constant 0 : index
    %22 = vector.load %arg14[%c32, %c0_19] : memref<288x256xf32, #tpu.memory_space<vmem>>, vector<8x256xf32>
    tpu.vector_store %arg14[%c32, %c0_19], %21 {strides = array<i32>} : memref<288x256xf32, #tpu.memory_space<vmem>>, vector<8x256xf32>,
    %c0_20 = arith.constant 0 : index
    %c129 = arith.constant 129 : index
    %23 = vector.load %arg13[%c0_20, %c129] : memref<32x512xf32, #tpu.memory_space<vmem>>, vector<8x256xf32>
    %24 = vector.broadcast %1 : vector<1x256xf32> to vector<8x256xf32>
    %25 = arith.mulf %23, %24 : vector<8x256xf32>
    %c40 = arith.constant 40 : index
    %c0_21 = arith.constant 0 : index
    %26 = vector.load %arg14[%c40, %c0_21] : memref<288x256xf32, #tpu.memory_space<vmem>>, vector<8x256xf32>
    tpu.vector_store %arg14[%c40, %c0_21], %25 {strides = array<i32>} : memref<288x256xf32, #tpu.memory_space<vmem>>, vector<8x256xf32>,
    %c0_22 = arith.constant 0 : index
    %c143 = arith.constant 143 : index
    %27 = vector.load %arg13[%c0_22, %c143] : memref<32x512xf32, #tpu.memory_space<vmem>>, vector<8x256xf32>
    %28 = vector.broadcast %0 : vector<1x256xf32> to vector<8x256xf32>
    %29 = arith.mulf %27, %28 : vector<8x256xf32>
    %c48 = arith.constant 48 : index
    %c0_23 = arith.constant 0 : index
    %30 = vector.load %arg14[%c48, %c0_23] : memref<288x256xf32, #tpu.memory_space<vmem>>, vector<8x256xf32>
    tpu.vector_store %arg14[%c48, %c0_23], %29 {strides = array<i32>} : memref<288x256xf32, #tpu.memory_space<vmem>>, vector<8x256xf32>,
    %c0_24 = arith.constant 0 : index
    %c144 = arith.constant 144 : index
    %31 = vector.load %arg13[%c0_24, %c144] : memref<32x512xf32, #tpu.memory_space<vmem>>, vector<8x256xf32>
    %c56 = arith.constant 56 : index
    %c0_25 = arith.constant 0 : index
    %32 = vector.load %arg14[%c56, %c0_25] : memref<288x256xf32, #tpu.memory_space<vmem>>, vector<8x256xf32>
    tpu.vector_store %arg14[%c56, %c0_25], %31 {strides = array<i32>} : memref<288x256xf32, #tpu.memory_space<vmem>>, vector<8x256xf32>,
    %c0_26 = arith.constant 0 : index
    %c145 = arith.constant 145 : index
    %33 = vector.load %arg13[%c0_26, %c145] : memref<32x512xf32, #tpu.memory_space<vmem>>, vector<8x256xf32>
    %34 = vector.broadcast %1 : vector<1x256xf32> to vector<8x256xf32>
    %35 = arith.mulf %33, %34 : vector<8x256xf32>
    %c64 = arith.constant 64 : index
    %c0_27 = arith.constant 0 : index
    %36 = vector.load %arg14[%c64, %c0_27] : memref<288x256xf32, #tpu.memory_space<vmem>>, vector<8x256xf32>
    tpu.vector_store %arg14[%c64, %c0_27], %35 {strides = array<i32>} : memref<288x256xf32, #tpu.memory_space<vmem>>, vector<8x256xf32>,
    %c0_28 = arith.constant 0 : index
    %c0_29 = arith.constant 0 : index
    %37 = vector.load %arg4[%c0_28, %c0_29] : memref<16x72xf32, #tpu.memory_space<vmem>>, vector<16x72xf32>
    %c0_30 = arith.constant 0 : index
    %c0_31 = arith.constant 0 : index
    %38 = vector.load %arg14[%c0_30, %c0_31] : memref<288x256xf32, #tpu.memory_space<vmem>>, vector<72x256xf32>
    %cst_32 = arith.constant dense<0.000000e+00> : vector<16x256xf32>
    %39 = tpu.matmul %37, %38, %cst_32 {dimension_numbers = #tpu.dot_dimension_numbers<[1], [0], [0], [1], [0, 0, 1, 1], [], []>} : vector<16x72xf32>, vector<72x256xf32>, vector<16x256xf32> -> vector<16x256xf32>
    %c0_33 = arith.constant 0 : index
    %c0_34 = arith.constant 0 : index
    %40 = vector.load %arg5[%c0_33, %c0_34] : memref<16x1xf32, #tpu.memory_space<vmem>>, vector<16x1xf32>
    %41 = vector.broadcast %40 : vector<16x1xf32> to vector<16x256xf32>
    %42 = arith.addf %39, %41 : vector<16x256xf32>
    %c0_35 = arith.constant 0 : index
    %43 = memref.load %arg1[%c0_35] : memref<3xf32, #tpu.memory_space<smem>>
    %cst_36 = arith.constant 0.000000e+00 : f32
    %44 = vector.broadcast %cst_36 : f32 to vector<16x256xf32>
    %45 = arith.cmpf oge, %42, %44 : vector<16x256xf32>
    %46 = vector.broadcast %43 : f32 to vector<16x256xf32>
    %47 = arith.mulf %46, %42 : vector<16x256xf32>
    %48 = arith.select %45, %42, %47 : vector<16x256xi1>, vector<16x256xf32>
    %c0_37 = arith.constant 0 : index
    %c128_38 = arith.constant 128 : index
    %49 = vector.load %arg13[%c0_37, %c128_38] : memref<32x512xf32, #tpu.memory_space<vmem>>, vector<16x256xf32>
    tpu.vector_store %arg13[%c0_37, %c128_38], %48 {strides = array<i32>} : memref<32x512xf32, #tpu.memory_space<vmem>>, vector<16x256xf32>,
    %c0_39 = arith.constant 0 : index
    %c111_40 = arith.constant 111 : index
    %50 = vector.load %arg13[%c0_39, %c111_40] : memref<32x512xf32, #tpu.memory_space<vmem>>, vector<16x256xf32>
    %51 = vector.broadcast %0 : vector<1x256xf32> to vector<16x256xf32>
    %52 = arith.mulf %50, %51 : vector<16x256xf32>
    %c0_41 = arith.constant 0 : index
    %c0_42 = arith.constant 0 : index
    %53 = vector.load %arg14[%c0_41, %c0_42] : memref<288x256xf32, #tpu.memory_space<vmem>>, vector<16x256xf32>
    tpu.vector_store %arg14[%c0_41, %c0_42], %52 {strides = array<i32>} : memref<288x256xf32, #tpu.memory_space<vmem>>, vector<16x256xf32>,
    %c0_43 = arith.constant 0 : index
    %c112_44 = arith.constant 112 : index
    %54 = vector.load %arg13[%c0_43, %c112_44] : memref<32x512xf32, #tpu.memory_space<vmem>>, vector<16x256xf32>
    %c16_45 = arith.constant 16 : index
    %c0_46 = arith.constant 0 : index
    %55 = vector.load %arg14[%c16_45, %c0_46] : memref<288x256xf32, #tpu.memory_space<vmem>>, vector<16x256xf32>
    tpu.vector_store %arg14[%c16_45, %c0_46], %54 {strides = array<i32>} : memref<288x256xf32, #tpu.memory_space<vmem>>, vector<16x256xf32>,
    %c0_47 = arith.constant 0 : index
    %c113_48 = arith.constant 113 : index
    %56 = vector.load %arg13[%c0_47, %c113_48] : memref<32x512xf32, #tpu.memory_space<vmem>>, vector<16x256xf32>
    %57 = vector.broadcast %1 : vector<1x256xf32> to vector<16x256xf32>
    %58 = arith.mulf %56, %57 : vector<16x256xf32>
    %c32_49 = arith.constant 32 : index
    %c0_50 = arith.constant 0 : index
    %59 = vector.load %arg14[%c32_49, %c0_50] : memref<288x256xf32, #tpu.memory_space<vmem>>, vector<16x256xf32>
    tpu.vector_store %arg14[%c32_49, %c0_50], %58 {strides = array<i32>} : memref<288x256xf32, #tpu.memory_space<vmem>>, vector<16x256xf32>,
    %c0_51 = arith.constant 0 : index
    %c127_52 = arith.constant 127 : index
    %60 = vector.load %arg13[%c0_51, %c127_52] : memref<32x512xf32, #tpu.memory_space<vmem>>, vector<16x256xf32>
    %61 = vector.broadcast %0 : vector<1x256xf32> to vector<16x256xf32>
    %62 = arith.mulf %60, %61 : vector<16x256xf32>
    %c48_53 = arith.constant 48 : index
    %c0_54 = arith.constant 0 : index
    %63 = vector.load %arg14[%c48_53, %c0_54] : memref<288x256xf32, #tpu.memory_space<vmem>>, vector<16x256xf32>
    tpu.vector_store %arg14[%c48_53, %c0_54], %62 {strides = array<i32>} : memref<288x256xf32, #tpu.memory_space<vmem>>, vector<16x256xf32>,
    %c0_55 = arith.constant 0 : index
    %c128_56 = arith.constant 128 : index
    %64 = vector.load %arg13[%c0_55, %c128_56] : memref<32x512xf32, #tpu.memory_space<vmem>>, vector<16x256xf32>
    %c64_57 = arith.constant 64 : index
    %c0_58 = arith.constant 0 : index
    %65 = vector.load %arg14[%c64_57, %c0_58] : memref<288x256xf32, #tpu.memory_space<vmem>>, vector<16x256xf32>
    tpu.vector_store %arg14[%c64_57, %c0_58], %64 {strides = array<i32>} : memref<288x256xf32, #tpu.memory_space<vmem>>, vector<16x256xf32>,
    %c0_59 = arith.constant 0 : index
    %c129_60 = arith.constant 129 : index
    %66 = vector.load %arg13[%c0_59, %c129_60] : memref<32x512xf32, #tpu.memory_space<vmem>>, vector<16x256xf32>
    %67 = vector.broadcast %1 : vector<1x256xf32> to vector<16x256xf32>
    %68 = arith.mulf %66, %67 : vector<16x256xf32>
    %c80 = arith.constant 80 : index
    %c0_61 = arith.constant 0 : index
    %69 = vector.load %arg14[%c80, %c0_61] : memref<288x256xf32, #tpu.memory_space<vmem>>, vector<16x256xf32>
    tpu.vector_store %arg14[%c80, %c0_61], %68 {strides = array<i32>} : memref<288x256xf32, #tpu.memory_space<vmem>>, vector<16x256xf32>,
    %c0_62 = arith.constant 0 : index
    %c143_63 = arith.constant 143 : index
    %70 = vector.load %arg13[%c0_62, %c143_63] : memref<32x512xf32, #tpu.memory_space<vmem>>, vector<16x256xf32>
    %71 = vector.broadcast %0 : vector<1x256xf32> to vector<16x256xf32>
    %72 = arith.mulf %70, %71 : vector<16x256xf32>
    %c96 = arith.constant 96 : index
    %c0_64 = arith.constant 0 : index
    %73 = vector.load %arg14[%c96, %c0_64] : memref<288x256xf32, #tpu.memory_space<vmem>>, vector<16x256xf32>
    tpu.vector_store %arg14[%c96, %c0_64], %72 {strides = array<i32>} : memref<288x256xf32, #tpu.memory_space<vmem>>, vector<16x256xf32>,
    %c0_65 = arith.constant 0 : index
    %c144_66 = arith.constant 144 : index
    %74 = vector.load %arg13[%c0_65, %c144_66] : memref<32x512xf32, #tpu.memory_space<vmem>>, vector<16x256xf32>
    %c112_67 = arith.constant 112 : index
    %c0_68 = arith.constant 0 : index
    %75 = vector.load %arg14[%c112_67, %c0_68] : memref<288x256xf32, #tpu.memory_space<vmem>>, vector<16x256xf32>
    tpu.vector_store %arg14[%c112_67, %c0_68], %74 {strides = array<i32>} : memref<288x256xf32, #tpu.memory_space<vmem>>, vector<16x256xf32>,
    %c0_69 = arith.constant 0 : index
    %c145_70 = arith.constant 145 : index
    %76 = vector.load %arg13[%c0_69, %c145_70] : memref<32x512xf32, #tpu.memory_space<vmem>>, vector<16x256xf32>
    %77 = vector.broadcast %1 : vector<1x256xf32> to vector<16x256xf32>
    %78 = arith.mulf %76, %77 : vector<16x256xf32>
    %c128_71 = arith.constant 128 : index
    %c0_72 = arith.constant 0 : index
    %79 = vector.load %arg14[%c128_71, %c0_72] : memref<288x256xf32, #tpu.memory_space<vmem>>, vector<16x256xf32>
    tpu.vector_store %arg14[%c128_71, %c0_72], %78 {strides = array<i32>} : memref<288x256xf32, #tpu.memory_space<vmem>>, vector<16x256xf32>,
    %c0_73 = arith.constant 0 : index
    %c0_74 = arith.constant 0 : index
    %80 = vector.load %arg6[%c0_73, %c0_74] : memref<32x144xf32, #tpu.memory_space<vmem>>, vector<32x144xf32>
    %c0_75 = arith.constant 0 : index
    %c0_76 = arith.constant 0 : index
    %81 = vector.load %arg14[%c0_75, %c0_76] : memref<288x256xf32, #tpu.memory_space<vmem>>, vector<144x256xf32>
    %cst_77 = arith.constant dense<0.000000e+00> : vector<32x256xf32>
    %82 = tpu.matmul %80, %81, %cst_77 {dimension_numbers = #tpu.dot_dimension_numbers<[1], [0], [0], [1], [0, 0, 1, 1], [], []>} : vector<32x144xf32>, vector<144x256xf32>, vector<32x256xf32> -> vector<32x256xf32>
    %c0_78 = arith.constant 0 : index
    %c0_79 = arith.constant 0 : index
    %83 = vector.load %arg7[%c0_78, %c0_79] : memref<32x1xf32, #tpu.memory_space<vmem>>, vector<32x1xf32>
    %84 = vector.broadcast %83 : vector<32x1xf32> to vector<32x256xf32>
    %85 = arith.addf %82, %84 : vector<32x256xf32>
    %c1_80 = arith.constant 1 : index
    %86 = memref.load %arg1[%c1_80] : memref<3xf32, #tpu.memory_space<smem>>
    %cst_81 = arith.constant 0.000000e+00 : f32
    %87 = vector.broadcast %cst_81 : f32 to vector<32x256xf32>
    %88 = arith.cmpf oge, %85, %87 : vector<32x256xf32>
    %89 = vector.broadcast %86 : f32 to vector<32x256xf32>
    %90 = arith.mulf %89, %85 : vector<32x256xf32>
    %91 = arith.select %88, %85, %90 : vector<32x256xi1>, vector<32x256xf32>
    %c0_82 = arith.constant 0 : index
    %c128_83 = arith.constant 128 : index
    %92 = vector.load %arg13[%c0_82, %c128_83] : memref<32x512xf32, #tpu.memory_space<vmem>>, vector<32x256xf32>
    tpu.vector_store %arg13[%c0_82, %c128_83], %91 {strides = array<i32>} : memref<32x512xf32, #tpu.memory_space<vmem>>, vector<32x256xf32>,
    %c0_84 = arith.constant 0 : index
    %c111_85 = arith.constant 111 : index
    %93 = vector.load %arg13[%c0_84, %c111_85] : memref<32x512xf32, #tpu.memory_space<vmem>>, vector<32x256xf32>
    %94 = vector.broadcast %0 : vector<1x256xf32> to vector<32x256xf32>
    %95 = arith.mulf %93, %94 : vector<32x256xf32>
    %c0_86 = arith.constant 0 : index
    %c0_87 = arith.constant 0 : index
    %96 = vector.load %arg14[%c0_86, %c0_87] : memref<288x256xf32, #tpu.memory_space<vmem>>, vector<32x256xf32>
    tpu.vector_store %arg14[%c0_86, %c0_87], %95 {strides = array<i32>} : memref<288x256xf32, #tpu.memory_space<vmem>>, vector<32x256xf32>,
    %c0_88 = arith.constant 0 : index
    %c112_89 = arith.constant 112 : index
    %97 = vector.load %arg13[%c0_88, %c112_89] : memref<32x512xf32, #tpu.memory_space<vmem>>, vector<32x256xf32>
    %c32_90 = arith.constant 32 : index
    %c0_91 = arith.constant 0 : index
    %98 = vector.load %arg14[%c32_90, %c0_91] : memref<288x256xf32, #tpu.memory_space<vmem>>, vector<32x256xf32>
    tpu.vector_store %arg14[%c32_90, %c0_91], %97 {strides = array<i32>} : memref<288x256xf32, #tpu.memory_space<vmem>>, vector<32x256xf32>,
    %c0_92 = arith.constant 0 : index
    %c113_93 = arith.constant 113 : index
    %99 = vector.load %arg13[%c0_92, %c113_93] : memref<32x512xf32, #tpu.memory_space<vmem>>, vector<32x256xf32>
    %100 = vector.broadcast %1 : vector<1x256xf32> to vector<32x256xf32>
    %101 = arith.mulf %99, %100 : vector<32x256xf32>
    %c64_94 = arith.constant 64 : index
    %c0_95 = arith.constant 0 : index
    %102 = vector.load %arg14[%c64_94, %c0_95] : memref<288x256xf32, #tpu.memory_space<vmem>>, vector<32x256xf32>
    tpu.vector_store %arg14[%c64_94, %c0_95], %101 {strides = array<i32>} : memref<288x256xf32, #tpu.memory_space<vmem>>, vector<32x256xf32>,
    %c0_96 = arith.constant 0 : index
    %c127_97 = arith.constant 127 : index
    %103 = vector.load %arg13[%c0_96, %c127_97] : memref<32x512xf32, #tpu.memory_space<vmem>>, vector<32x256xf32>
    %104 = vector.broadcast %0 : vector<1x256xf32> to vector<32x256xf32>
    %105 = arith.mulf %103, %104 : vector<32x256xf32>
    %c96_98 = arith.constant 96 : index
    %c0_99 = arith.constant 0 : index
    %106 = vector.load %arg14[%c96_98, %c0_99] : memref<288x256xf32, #tpu.memory_space<vmem>>, vector<32x256xf32>
    tpu.vector_store %arg14[%c96_98, %c0_99], %105 {strides = array<i32>} : memref<288x256xf32, #tpu.memory_space<vmem>>, vector<32x256xf32>,
    %c0_100 = arith.constant 0 : index
    %c128_101 = arith.constant 128 : index
    %107 = vector.load %arg13[%c0_100, %c128_101] : memref<32x512xf32, #tpu.memory_space<vmem>>, vector<32x256xf32>
    %c128_102 = arith.constant 128 : index
    %c0_103 = arith.constant 0 : index
    %108 = vector.load %arg14[%c128_102, %c0_103] : memref<288x256xf32, #tpu.memory_space<vmem>>, vector<32x256xf32>
    tpu.vector_store %arg14[%c128_102, %c0_103], %107 {strides = array<i32>} : memref<288x256xf32, #tpu.memory_space<vmem>>, vector<32x256xf32>,
    %c0_104 = arith.constant 0 : index
    %c129_105 = arith.constant 129 : index
    %109 = vector.load %arg13[%c0_104, %c129_105] : memref<32x512xf32, #tpu.memory_space<vmem>>, vector<32x256xf32>
    %110 = vector.broadcast %1 : vector<1x256xf32> to vector<32x256xf32>
    %111 = arith.mulf %109, %110 : vector<32x256xf32>
    %c160 = arith.constant 160 : index
    %c0_106 = arith.constant 0 : index
    %112 = vector.load %arg14[%c160, %c0_106] : memref<288x256xf32, #tpu.memory_space<vmem>>, vector<32x256xf32>
    tpu.vector_store %arg14[%c160, %c0_106], %111 {strides = array<i32>} : memref<288x256xf32, #tpu.memory_space<vmem>>, vector<32x256xf32>,
    %c0_107 = arith.constant 0 : index
    %c143_108 = arith.constant 143 : index
    %113 = vector.load %arg13[%c0_107, %c143_108] : memref<32x512xf32, #tpu.memory_space<vmem>>, vector<32x256xf32>
    %114 = vector.broadcast %0 : vector<1x256xf32> to vector<32x256xf32>
    %115 = arith.mulf %113, %114 : vector<32x256xf32>
    %c192 = arith.constant 192 : index
    %c0_109 = arith.constant 0 : index
    %116 = vector.load %arg14[%c192, %c0_109] : memref<288x256xf32, #tpu.memory_space<vmem>>, vector<32x256xf32>
    tpu.vector_store %arg14[%c192, %c0_109], %115 {strides = array<i32>} : memref<288x256xf32, #tpu.memory_space<vmem>>, vector<32x256xf32>,
    %c0_110 = arith.constant 0 : index
    %c144_111 = arith.constant 144 : index
    %117 = vector.load %arg13[%c0_110, %c144_111] : memref<32x512xf32, #tpu.memory_space<vmem>>, vector<32x256xf32>
    %c224 = arith.constant 224 : index
    %c0_112 = arith.constant 0 : index
    %118 = vector.load %arg14[%c224, %c0_112] : memref<288x256xf32, #tpu.memory_space<vmem>>, vector<32x256xf32>
    tpu.vector_store %arg14[%c224, %c0_112], %117 {strides = array<i32>} : memref<288x256xf32, #tpu.memory_space<vmem>>, vector<32x256xf32>,
    %c0_113 = arith.constant 0 : index
    %c145_114 = arith.constant 145 : index
    %119 = vector.load %arg13[%c0_113, %c145_114] : memref<32x512xf32, #tpu.memory_space<vmem>>, vector<32x256xf32>
    %120 = vector.broadcast %1 : vector<1x256xf32> to vector<32x256xf32>
    %121 = arith.mulf %119, %120 : vector<32x256xf32>
    %c256 = arith.constant 256 : index
    %c0_115 = arith.constant 0 : index
    %122 = vector.load %arg14[%c256, %c0_115] : memref<288x256xf32, #tpu.memory_space<vmem>>, vector<32x256xf32>
    tpu.vector_store %arg14[%c256, %c0_115], %121 {strides = array<i32>} : memref<288x256xf32, #tpu.memory_space<vmem>>, vector<32x256xf32>,
    %c0_116 = arith.constant 0 : index
    %c0_117 = arith.constant 0 : index
    %123 = vector.load %arg8[%c0_116, %c0_117] : memref<16x288xf32, #tpu.memory_space<vmem>>, vector<16x288xf32>
    %c0_118 = arith.constant 0 : index
    %c0_119 = arith.constant 0 : index
    %124 = vector.load %arg14[%c0_118, %c0_119] : memref<288x256xf32, #tpu.memory_space<vmem>>, vector<288x256xf32>
    %cst_120 = arith.constant dense<0.000000e+00> : vector<16x256xf32>
    %125 = tpu.matmul %123, %124, %cst_120 {dimension_numbers = #tpu.dot_dimension_numbers<[1], [0], [0], [1], [0, 0, 1, 1], [], []>} : vector<16x288xf32>, vector<288x256xf32>, vector<16x256xf32> -> vector<16x256xf32>
    %c0_121 = arith.constant 0 : index
    %c0_122 = arith.constant 0 : index
    %126 = vector.load %arg9[%c0_121, %c0_122] : memref<16x1xf32, #tpu.memory_space<vmem>>, vector<16x1xf32>
    %127 = vector.broadcast %126 : vector<16x1xf32> to vector<16x256xf32>
    %128 = arith.addf %125, %127 : vector<16x256xf32>
    %c2 = arith.constant 2 : index
    %129 = memref.load %arg1[%c2] : memref<3xf32, #tpu.memory_space<smem>>
    %cst_123 = arith.constant 0.000000e+00 : f32
    %130 = vector.broadcast %cst_123 : f32 to vector<16x256xf32>
    %131 = arith.cmpf oge, %128, %130 : vector<16x256xf32>
    %132 = vector.broadcast %129 : f32 to vector<16x256xf32>
    %133 = arith.mulf %132, %128 : vector<16x256xf32>
    %134 = arith.select %131, %128, %133 : vector<16x256xi1>, vector<16x256xf32>
    %c0_124 = arith.constant 0 : index
    %c128_125 = arith.constant 128 : index
    %135 = vector.load %arg13[%c0_124, %c128_125] : memref<32x512xf32, #tpu.memory_space<vmem>>, vector<16x256xf32>
    tpu.vector_store %arg13[%c0_124, %c128_125], %134 {strides = array<i32>} : memref<32x512xf32, #tpu.memory_space<vmem>>, vector<16x256xf32>,
    %c0_126 = arith.constant 0 : index
    %c111_127 = arith.constant 111 : index
    %136 = vector.load %arg13[%c0_126, %c111_127] : memref<32x512xf32, #tpu.memory_space<vmem>>, vector<16x256xf32>
    %137 = vector.broadcast %0 : vector<1x256xf32> to vector<16x256xf32>
    %138 = arith.mulf %136, %137 : vector<16x256xf32>
    %c0_128 = arith.constant 0 : index
    %c0_129 = arith.constant 0 : index
    %139 = vector.load %arg14[%c0_128, %c0_129] : memref<288x256xf32, #tpu.memory_space<vmem>>, vector<16x256xf32>
    tpu.vector_store %arg14[%c0_128, %c0_129], %138 {strides = array<i32>} : memref<288x256xf32, #tpu.memory_space<vmem>>, vector<16x256xf32>,
    %c0_130 = arith.constant 0 : index
    %c112_131 = arith.constant 112 : index
    %140 = vector.load %arg13[%c0_130, %c112_131] : memref<32x512xf32, #tpu.memory_space<vmem>>, vector<16x256xf32>
    %c16_132 = arith.constant 16 : index
    %c0_133 = arith.constant 0 : index
    %141 = vector.load %arg14[%c16_132, %c0_133] : memref<288x256xf32, #tpu.memory_space<vmem>>, vector<16x256xf32>
    tpu.vector_store %arg14[%c16_132, %c0_133], %140 {strides = array<i32>} : memref<288x256xf32, #tpu.memory_space<vmem>>, vector<16x256xf32>,
    %c0_134 = arith.constant 0 : index
    %c113_135 = arith.constant 113 : index
    %142 = vector.load %arg13[%c0_134, %c113_135] : memref<32x512xf32, #tpu.memory_space<vmem>>, vector<16x256xf32>
    %143 = vector.broadcast %1 : vector<1x256xf32> to vector<16x256xf32>
    %144 = arith.mulf %142, %143 : vector<16x256xf32>
    %c32_136 = arith.constant 32 : index
    %c0_137 = arith.constant 0 : index
    %145 = vector.load %arg14[%c32_136, %c0_137] : memref<288x256xf32, #tpu.memory_space<vmem>>, vector<16x256xf32>
    tpu.vector_store %arg14[%c32_136, %c0_137], %144 {strides = array<i32>} : memref<288x256xf32, #tpu.memory_space<vmem>>, vector<16x256xf32>,
    %c0_138 = arith.constant 0 : index
    %c127_139 = arith.constant 127 : index
    %146 = vector.load %arg13[%c0_138, %c127_139] : memref<32x512xf32, #tpu.memory_space<vmem>>, vector<16x256xf32>
    %147 = vector.broadcast %0 : vector<1x256xf32> to vector<16x256xf32>
    %148 = arith.mulf %146, %147 : vector<16x256xf32>
    %c48_140 = arith.constant 48 : index
    %c0_141 = arith.constant 0 : index
    %149 = vector.load %arg14[%c48_140, %c0_141] : memref<288x256xf32, #tpu.memory_space<vmem>>, vector<16x256xf32>
    tpu.vector_store %arg14[%c48_140, %c0_141], %148 {strides = array<i32>} : memref<288x256xf32, #tpu.memory_space<vmem>>, vector<16x256xf32>,
    %c0_142 = arith.constant 0 : index
    %c128_143 = arith.constant 128 : index
    %150 = vector.load %arg13[%c0_142, %c128_143] : memref<32x512xf32, #tpu.memory_space<vmem>>, vector<16x256xf32>
    %c64_144 = arith.constant 64 : index
    %c0_145 = arith.constant 0 : index
    %151 = vector.load %arg14[%c64_144, %c0_145] : memref<288x256xf32, #tpu.memory_space<vmem>>, vector<16x256xf32>
    tpu.vector_store %arg14[%c64_144, %c0_145], %150 {strides = array<i32>} : memref<288x256xf32, #tpu.memory_space<vmem>>, vector<16x256xf32>,
    %c0_146 = arith.constant 0 : index
    %c129_147 = arith.constant 129 : index
    %152 = vector.load %arg13[%c0_146, %c129_147] : memref<32x512xf32, #tpu.memory_space<vmem>>, vector<16x256xf32>
    %153 = vector.broadcast %1 : vector<1x256xf32> to vector<16x256xf32>
    %154 = arith.mulf %152, %153 : vector<16x256xf32>
    %c80_148 = arith.constant 80 : index
    %c0_149 = arith.constant 0 : index
    %155 = vector.load %arg14[%c80_148, %c0_149] : memref<288x256xf32, #tpu.memory_space<vmem>>, vector<16x256xf32>
    tpu.vector_store %arg14[%c80_148, %c0_149], %154 {strides = array<i32>} : memref<288x256xf32, #tpu.memory_space<vmem>>, vector<16x256xf32>,
    %c0_150 = arith.constant 0 : index
    %c143_151 = arith.constant 143 : index
    %156 = vector.load %arg13[%c0_150, %c143_151] : memref<32x512xf32, #tpu.memory_space<vmem>>, vector<16x256xf32>
    %157 = vector.broadcast %0 : vector<1x256xf32> to vector<16x256xf32>
    %158 = arith.mulf %156, %157 : vector<16x256xf32>
    %c96_152 = arith.constant 96 : index
    %c0_153 = arith.constant 0 : index
    %159 = vector.load %arg14[%c96_152, %c0_153] : memref<288x256xf32, #tpu.memory_space<vmem>>, vector<16x256xf32>
    tpu.vector_store %arg14[%c96_152, %c0_153], %158 {strides = array<i32>} : memref<288x256xf32, #tpu.memory_space<vmem>>, vector<16x256xf32>,
    %c0_154 = arith.constant 0 : index
    %c144_155 = arith.constant 144 : index
    %160 = vector.load %arg13[%c0_154, %c144_155] : memref<32x512xf32, #tpu.memory_space<vmem>>, vector<16x256xf32>
    %c112_156 = arith.constant 112 : index
    %c0_157 = arith.constant 0 : index
    %161 = vector.load %arg14[%c112_156, %c0_157] : memref<288x256xf32, #tpu.memory_space<vmem>>, vector<16x256xf32>
    tpu.vector_store %arg14[%c112_156, %c0_157], %160 {strides = array<i32>} : memref<288x256xf32, #tpu.memory_space<vmem>>, vector<16x256xf32>,
    %c0_158 = arith.constant 0 : index
    %c145_159 = arith.constant 145 : index
    %162 = vector.load %arg13[%c0_158, %c145_159] : memref<32x512xf32, #tpu.memory_space<vmem>>, vector<16x256xf32>
    %163 = vector.broadcast %1 : vector<1x256xf32> to vector<16x256xf32>
    %164 = arith.mulf %162, %163 : vector<16x256xf32>
    %c128_160 = arith.constant 128 : index
    %c0_161 = arith.constant 0 : index
    %165 = vector.load %arg14[%c128_160, %c0_161] : memref<288x256xf32, #tpu.memory_space<vmem>>, vector<16x256xf32>
    tpu.vector_store %arg14[%c128_160, %c0_161], %164 {strides = array<i32>} : memref<288x256xf32, #tpu.memory_space<vmem>>, vector<16x256xf32>,
    %c0_162 = arith.constant 0 : index
    %c0_163 = arith.constant 0 : index
    %166 = vector.load %arg10[%c0_162, %c0_163] : memref<1x144xf32, #tpu.memory_space<vmem>>, vector<1x144xf32>
    %c0_164 = arith.constant 0 : index
    %c0_165 = arith.constant 0 : index
    %167 = vector.load %arg14[%c0_164, %c0_165] : memref<288x256xf32, #tpu.memory_space<vmem>>, vector<144x256xf32>
    %cst_166 = arith.constant dense<0.000000e+00> : vector<1x256xf32>
    %168 = tpu.matmul %166, %167, %cst_166 {dimension_numbers = #tpu.dot_dimension_numbers<[1], [0], [0], [1], [0, 0, 1, 1], [], []>} : vector<1x144xf32>, vector<144x256xf32>, vector<1x256xf32> -> vector<1x256xf32>
    %c0_167 = arith.constant 0 : index
    %c0_168 = arith.constant 0 : index
    %169 = vector.load %arg11[%c0_167, %c0_168] : memref<1x1xf32, #tpu.memory_space<vmem>>, vector<1x1xf32>
    %170 = vector.broadcast %169 : vector<1x1xf32> to vector<1x256xf32>
    %171 = arith.addf %168, %170 : vector<1x256xf32>
    %172 = math.tanh %171 : vector<1x256xf32>
    %c0_169 = arith.constant 0 : index
    %c0_170 = arith.constant 0 : index
    %c0_171 = arith.constant 0 : index
    %173 = vector.load %arg12[%c0_169, %c0_170, %c0_171] : memref<1x1x256xf32, #tpu.memory_space<vmem>>, vector<1x1x256xf32>
    %174 = vector.shape_cast %173 : vector<1x1x256xf32> to vector<1x256xf32>
    %175 = vector.shape_cast %172 : vector<1x256xf32> to vector<1x1x256xf32>
    tpu.vector_store %arg12[%c0_169, %c0_170, %c0_171], %175 {strides = array<i32>} : memref<1x1x256xf32, #tpu.memory_space<vmem>>, vector<1x1x256xf32>,
    return
  }
  func.func @transform_0(%arg0: i32) -> i32 {
    %c0_i32 = arith.constant 0 : i32
    %c0_i32_0 = arith.constant 0 : i32
    return %c0_i32 : i32
  }
  func.func @transform_1(%arg0: i32) -> (i32, i32) {
    %c0_i32 = arith.constant 0 : i32
    %c0_i32_0 = arith.constant 0 : i32
    %c0_i32_1 = arith.constant 0 : i32
    return %c0_i32, %c0_i32_0 : i32, i32
  }
  func.func @transform_2(%arg0: i32) -> (i32, i32, i32) {
    %c0_i32 = arith.constant 0 : i32
    %c0_i32_0 = arith.constant 0 : i32
    %c0_i32_1 = arith.constant 0 : i32
    return %arg0, %c0_i32, %c0_i32_0 : i32, i32, i32
  }
  func.func @transform_3(%arg0: i32) -> (i32, i32) {
    %c0_i32 = arith.constant 0 : i32
    %c0_i32_0 = arith.constant 0 : i32
    %c0_i32_1 = arith.constant 0 : i32
    return %c0_i32, %c0_i32_0 : i32, i32
  }
  func.func @transform_4(%arg0: i32) -> (i32, i32) {
    %c0_i32 = arith.constant 0 : i32
    %c0_i32_0 = arith.constant 0 : i32
    %c0_i32_1 = arith.constant 0 : i32
    return %c0_i32, %c0_i32_0 : i32, i32
  }
  func.func @transform_5(%arg0: i32) -> (i32, i32) {
    %c0_i32 = arith.constant 0 : i32
    %c0_i32_0 = arith.constant 0 : i32
    %c0_i32_1 = arith.constant 0 : i32
    return %c0_i32, %c0_i32_0 : i32, i32
  }
  func.func @transform_6(%arg0: i32) -> (i32, i32) {
    %c0_i32 = arith.constant 0 : i32
    %c0_i32_0 = arith.constant 0 : i32
    %c0_i32_1 = arith.constant 0 : i32
    return %c0_i32, %c0_i32_0 : i32, i32
  }
  func.func @transform_7(%arg0: i32) -> (i32, i32) {
    %c0_i32 = arith.constant 0 : i32
    %c0_i32_0 = arith.constant 0 : i32
    %c0_i32_1 = arith.constant 0 : i32
    return %c0_i32, %c0_i32_0 : i32, i32
  }
  func.func @transform_8(%arg0: i32) -> (i32, i32) {
    %c0_i32 = arith.constant 0 : i32
    %c0_i32_0 = arith.constant 0 : i32
    %c0_i32_1 = arith.constant 0 : i32
    return %c0_i32, %c0_i32_0 : i32, i32
  }
  func.func @transform_9(%arg0: i32) -> (i32, i32) {
    %c0_i32 = arith.constant 0 : i32
    %c0_i32_0 = arith.constant 0 : i32
    %c0_i32_1 = arith.constant 0 : i32
    return %c0_i32, %c0_i32_0 : i32, i32
  }
  func.func @transform_10(%arg0: i32) -> (i32, i32) {
    %c0_i32 = arith.constant 0 : i32
    %c0_i32_0 = arith.constant 0 : i32
    %c0_i32_1 = arith.constant 0 : i32
    return %c0_i32, %c0_i32_0 : i32, i32
  }
  func.func @transform_11(%arg0: i32) -> (i32, i32, i32) {
    %c0_i32 = arith.constant 0 : i32
    %c0_i32_0 = arith.constant 0 : i32
    %c0_i32_1 = arith.constant 0 : i32
    return %arg0, %c0_i32, %c0_i32_0 : i32, i32, i32
  }
}

</mosaic_0001>

<bundles_post_ra>
// kernel: tpu_custom_call.1
= control target key start
LH: loop header
LB: loop body
LE: loop exit
PB: predicated region body
PF: predicated region fallthrough
CT: control target
= control target key end

     0   :  { %s5058_s0 = inlined_call_operand.hbm [shape: f32[3], index: 0, kind: input, shape index: {}]   ;;  %s5059_s1 = inlined_call_operand.hbm [shape: f32[2,256], index: 1, kind: input, shape index: {}]   ;;  %s5060_s2 = inlined_call_operand.vmem [shape: f32[2,4,256], index: 2, kind: input, shape index: {}]   ;;  %s5061_s3 = inlined_call_operand.hbm [shape: f32[16,72], index: 3, kind: input, shape index: {}]   ;;  %s5062_s4 = inlined_call_operand.vmem [shape: f32[16,1], index: 4, kind: input, shape index: {}]   ;;  %s5063_s5 = inlined_call_operand.hbm [shape: f32[32,144], index: 5, kind: input, shape index: {}]   ;;  %s5064_s6 = inlined_call_operand.vmem [shape: f32[32,1], index: 6, kind: input, shape index: {}]   ;;  %s5065_s7 = inlined_call_operand.vmem [shape: f32[16,288], index: 7, kind: input, shape index: {}]   ;;  %s5066_s8 = inlined_call_operand.vmem [shape: f32[16,1], index: 8, kind: input, shape index: {}]   ;;  %s5067_s9 = inlined_call_operand.vmem [shape: f32[1,144], index: 9, kind: input, shape index: {}]   ;;  %s5068_s10 = inlined_call_operand.<no memory space> [shape: f32[1,1], index: 10, kind: input, shape index: {}]   ;;  %s5069_s11 = inlined_call_operand.hbm [shape: f32[2,1,256], index: 11, kind: output, shape index: {}]  }
   0x1   :  { %5073 = sst [smem:[#allocation21_spill]] %s5058_s0  ;;  %v16_v0 = vstv %s5068_s10 }
   0x2   :  { %5074 = sst [smem:[#allocation22_spill]] %s5061_s3  ;;  %17 = vst [vmem:[#allocation4] sm:$0x1] %v16_v0 }
   0x3   :  { %18 = vsyncpa [#allocation8], 0 }
   0x4   :  { %19 = vsyncpa [#allocation6], 0 }
   0x5   :  { %20 = vsyncpa [#allocation11], 0 }
   0x6   :  { %21 = vsyncpa [#allocation7], 0 }
   0x7   :  { %23 = vsyncpa [#allocation7 + $0x1], 0  ;;  %s3809_s19 = smov 0   ;;  %s3811_s20 = smov 0  }
   0x8   :  { %s3813_s21 = smov 0   ;;  %s3815_s22 = smov 0  }
   0x9 LB: > { %5075 = sst [smem:[#allocation18_spill]] %s3722_s21  ;;  %s3830_s10 = sadd.s32 4294967295, %s3726_s22   ;;  %s3726_s22 = sphi %s3815_s22, %s5084_s22   ;;  %s3722_s21 = sphi %s3813_s21, %s5086_s21   ;;  %s3718_s20 = sphi %s3811_s20, %s5088_s20   ;;  %s3714_s19 = sphi %s3809_s19, %s5087_s19  }
   0xa   : > { %s2880_s23 = sadd.s32 4294967294, %s3726_s22   ;;  %s3834_s24 = sadd.s32 1, %s3726_s22  }
   0xb   : > { %5076 = sst [smem:[#allocation19_spill]] %s3834_s24  ;;  %s272_s25 = sadd.s32 1, %s3722_s21 }
   0xc   : > { %s269_s26 = ssub.s32 %s3726_s22, %s3834_s24  ;;  %p282_p0 = scmp.ne.s32.totalorder %s3722_s21, %s3718_s20 }
   0xd   : > { %p270_p1 = scmp.eq.s32.totalorder %s269_s26, 0  ;;  %p283_p2 = scmp.eq.s32.totalorder %s3830_s10, 1 }
   0xe   : > { %p288_p3 = scmp.ne.s32.totalorder %s3718_s20, %s3714_s19  ;;  %p289_p4 = scmp.eq.s32.totalorder %s2880_s23, 1 }
   0xf   : > { %s3845_s27 = scalar_select %p270_p1, %s3722_s21, %s272_s25  }
  0x10   : > { %p3847_p5 = por %p283_p2, %p282_p0  ;;  %p3851_p6 = por %p289_p4, %p288_p3 }
  0x11   : > { %5077 = sst [smem:[#allocation20_spill]] %s3845_s27  ;;  %p2881_p7 = scmp.ge.s32.totalorder %s3726_s22, 1 }
  0x12   : > { %p296_p8 = scmp.lt.s32.totalorder %s3726_s22, 3  ;;  %p2959_p9 = scmp.eq.s32.totalorder %s3830_s10, 0 }
  0x13   : > { %s5081_s3 = sld [smem:[#allocation22_spill]]  ;;  %s3728_s15 = smov [#allocation10]  }
  0x14   : > { %p3858_p10 = pnand %p2881_p7, %p296_p8  ;;  %s331_s16 = sshll.u32 %s3728_s15, 4  ;;  %s332_s16 = int_to_ptr.vmem [resolvable:$true] %s331_s16 }
  0x15   : > { %s5083_s0 = sld [smem:[#allocation21_spill]]  ;;  %s3729_s26 = smov 128  }
  0x16   : > { %p2942_p11 = pneg %p3858_p10  ;;  %s3730_s12 = smov 8  }
  0x17   : > { %s3731_s13 = smov [#allocation5]   ;;  %s318_s27 = sshll.u32 %s5059_s1, 4  ;;  %s319_s27 = int_to_ptr.hbm [resolvable:$true] %s318_s27 }
  0x18   : > { %p3869_p12 = pnand %p2959_p9, %p2942_p11  ;;  %s3732_s21 = smov [#allocation9]  }
  0x19   : > { %s329_s14 = sshll.u32 %s5081_s3, 4  ;;  %s320_s18 = sshll.u32 %s3732_s21, 4  ;;  %s330_s14 = int_to_ptr.hbm [resolvable:$true] %s329_s14  ;;  %s321_s18 = int_to_ptr.vmem [resolvable:$true] %s320_s18 }
  0x1a   : > { %2951 = dma.hbm_to_vmem [thread:$0]  (!%p3869_p12), %s330_s14, 256, %s332_s16, [#allocation11], %s3729_s26, %s3729_s26, %s3730_s12  }
  0x1b   : > { %s308_s25 = sshll.u32 %s5083_s0, 4  ;;  %s346_s0 = sshll.u32 %s5063_s5, 4  ;;  %s309_s25 = int_to_ptr.hbm [resolvable:$true] %s308_s25  ;;  %s347_s0 = int_to_ptr.hbm [resolvable:$true] %s346_s0 }
  0x1c   : > { %2945 = dma.hbm_to_smem (!%p3869_p12), %s309_s25, 16, %s3731_s13, [#allocation8]  }
  0x1d   : > { %2948 = dma.hbm_to_vmem [thread:$0]  (!%p3869_p12), %s319_s27, 64, %s321_s18, [#allocation6]  }
  0x1e   : > { %s3733_s14 = smov [#allocation12]   ;;  %s3734_s26 = smov 256  }
  0x1f   : > { %s348_s16 = sshll.u32 %s3733_s14, 4  ;;  %s3735_s25 = smov 16   ;;  %s349_s16 = int_to_ptr.vmem [resolvable:$true] %s348_s16 }
  0x20   : > { %2954 = dma.hbm_to_vmem [thread:$0]  (!%p3869_p12), %s347_s0, 1024, %s349_s16, [#allocation11], %s3734_s26, %s3734_s26, %s3735_s25  }
  0x21   : > { %387 = sbr.rel (%p3858_p10) target bundleno = 1492 (0x5d4), region = 64 }
  0x26   : > { %3697 = dma.done.wait (%p2959_p9), [#allocation8], 16  }
  0x27   : > { %3699 = vsyncadd (%p2959_p9), [#allocation8], 4294967280 }
  0x28   : > { %3701 = dma.done.wait (%p2959_p9), [#allocation6], 64  }
  0x29   : > { %3703 = vsyncadd (%p2959_p9), [#allocation6], 4294967232 }
  0x2a   : > { %3705 = dma.done.wait (%p2959_p9), [#allocation11], 1280  }
  0x2b   : > { %3707 = vsyncadd (%p2959_p9), [#allocation11], 4294966016 }
  0x2c   : > { %409 = sfence }
  0x2d   : > { %v451_v1 = vld [vmem:[#allocation9 + $0x1] ss:$2 sm:$0x3]  ;;  %v449_v3 = vld [vmem:[#allocation9] ss:$2 sm:$0x3] }
  0x2e   : > { %v534_v2 = vperm.slane %v451_v1, 0  ;;  %v481_v4 = vperm.slane %v449_v3, 0  ;;  %s3736_s0 = smov 17   ;;  %s3737_s3 = smov 1   ;;  %v535_v5 = vperm.slane %v451_v1, 1  ;;  %v482_v6 = vperm.slane %v449_v3, 1 }
  0x2f   : > { %s3738_s21 = smov 15   ;;  %s3739_s24 = smov 127   ;;  %v3742_v8 = vmov 0.0   ;;  %vm557_vm0 = vcmask 121856   ;;  %vm504_vm1 = vcmask 138240   ;;  %vm540_vm2 = vcmask 924672  }
  0x30   : > { %679 = vrot.lane.b32.xlu0 %v534_v2, %s3736_s0  ;;  %602 = vrot.lane.b32.xlu2 %v534_v2, %s3737_s3  ;;  %s3740_s27 = smov 113   ;;  %s3741_s30 = smov 111   ;;  %453 = vst [vmem:[#allocation2] sm:$0xff] %v3742_v8  ;;  %vm571_vm3 = vcmask 1039360   ;;  %vm588_vm4 = vcmask 7168   ;;  %vm487_vm5 = vcmask 908288  }
  0x31   : > { %631 = vrot.lane.b32.xlu1 %v481_v4, %s3738_s21  ;;  %p444_p13 = scmp.lt.s32.totalorder %s3830_s10, 1  ;;  %s3743_s23 = smov 112   ;;  %454 = vst [vmem:[#allocation2 + $0x58] sm:$0xff] %v3742_v8  ;;  %vm669_vm6 = vcmask 916480   ;;  %vm523_vm7 = vcmask 130048   ;;  %vm737_vm8 = vcmask 588800  }
  0x32   : > { %452 = vst [vmem:[#allocation2 + $0x30] sm:$0xff] %v3742_v8  ;;  %s3744_s14 = smov 16   ;;  %s2907_s13 = sld [smem:[#allocation5 + $0x1]] }
  0x33   : > { %s445_s17 = scalar_select %p444_p13, %s3830_s10, 1 }
  0x34   : > { %s2912_s15 = sld [smem:[#allocation5 + $0x2]] }
  0x35   : > { %s2919_s12 = sshll.u32 %s445_s17, 3 }
  0x36   : > { %s448_s18 = scalar_lea.vmem %s5060_s2, %s2919_s12  ;;  %s790_s12 = sld [smem:[#allocation5]] }
  0x37   : > { %v468_v7 = vld [vmem:[%s448_s18] sm:$0xff] }
  0x38   : > { %681 = vrot.lane.b32.xlu0 %v535_v5, %s3736_s0  ;;  %604 = vrot.lane.b32.xlu2 %v535_v5, %s3737_s3  ;;  %470 = vst [vmem:[#allocation1] ss:$2 sm:$0xff] %v468_v7 }
  0x39   : > { %633 = vrot.lane.b32.xlu1 %v482_v6, %s3738_s21 }
  0x3f   : > { %v471_v9 = vld.sshfl [vmem:[#allocation1] sm:$0xff pattern:$0x75316420]  ;;  %v472_v10 = vld.sshfl [vmem:[#allocation1 + $0x8] sm:$0xff pattern:$0x75316420] }
  0x40   : > { %567 = vrot.lane.b32.xlu0 %v481_v4, %s3739_s24  ;;  %536 = vrot.lane.b32.xlu2 %v534_v2, %s3740_s27  ;;  %475 = vst [vmem:[#allocation2] sm:$0xf] %v471_v9 }
  0x41   : > { %569 = vrot.lane.b32.xlu1 %v482_v6, %s3739_s24  ;;  %476 = vst [vmem:[#allocation2 + $0x58] sm:$0xf] %v472_v10 }
  0x47   : > { %v3926_v11 = vld [vmem:[#allocation2] sm:$0xff] }
  0x48   : > { %538 = vrot.lane.b32.xlu0 %v535_v5, %s3740_s27  ;;  %485 = vrot.lane.b32.xlu2 %v482_v6, %s3741_s30  ;;  %v3928_v12 = vld [vmem:[#allocation2 + $0x58] sm:$0xff]  ;;  %v3038_v55 = vpack.i.bf16 %v3926_v11, %v3742_v8 }
  0x49   : > { %483 = vrot.lane.b32.xlu1 %v481_v4, %s3741_s30  ;;  %v3018_v13 = vpack.i.bf16 %v3928_v12, %v3926_v11 }
  0x50   : > { %667 = vrot.lane.b32.xlu0 %v3742_v8, %s3743_s23  ;;  %3019 = vrot.lane.b32.xlu2 %v3018_v13, %s3743_s23 }
  0x8a   : > { %v3937_v16 = vpop.permute.xlu2 %602 }
  0x8b   : > { %v610_v46 = vmul.f32 %v3926_v11, %v3937_v16 }
  0x92   : > { %v3953_v21 = vpop.permute.xlu2 %604 }
  0x93   : > { %v3956_v22 = vmul.f32 0.0, %v3953_v21  ;;  %v4006_v39 = vsel %vm588_vm4, %v3937_v16, %v3953_v21 }
  0x94   : > { %v611_v47 = vmul.f32 %v3928_v12, %v4006_v39 }
  0x96   : > { %v3033_v51 = vpack.i.bf16 %v611_v47, %v610_v46 }
  0x9a   : > { %v3979_v29 = vpop.permute.xlu2 %536 }
  0x9b   : > { %v4009_v40 = vmul.f32 0.0, %v3979_v29 }
  0xa2   : > { %v3933_v14 = vpop.permute.xlu0 %679  ;;  %v4019_v44 = vpop.permute.xlu2 %485 }
  0xa3   : > { %v3935_v15 = vpop.permute.xlu1 %631  ;;  %v687_v33 = vmul.f32 %v3933_v14, %v3926_v11  ;;  %v494_v56 = vmul.f32 %v3928_v12, %v4019_v44 }
  0xa4   : > { %v639_v31 = vmul.f32 %v3926_v11, %v3935_v15 }
  0xaa   : > { %v3939_v17 = vpop.permute.xlu0 %681  ;;  %v3020_v58 = vpop.permute.xlu2 %3019 }
  0xab   : > { %v3941_v18 = vpop.permute.xlu1 %633  ;;  %v3944_v19 = vmul.f32 0.0, %v3939_v17  ;;  %v3974_v27 = vsel %vm504_vm1, %v3933_v14, %v3939_v17  ;;  %v3022_v3 = vunpack.i.h.bf16 %v3020_v58  ;;  %v3021_v4 = vunpack.i.l.bf16 %v3020_v58 }
  0xac   : > { %v3947_v20 = vmul.f32 0.0, %v3941_v18  ;;  %v3967_v26 = vsel %vm557_vm0, %v3935_v15, %v3941_v18  ;;  %v688_v30 = vmul.f32 %v3974_v27, %v3928_v12 }
  0xad   : > { %697 = vrot.lane.b32.xlu1 %v3944_v19, %s3741_s30  ;;  %v640_v28 = vmul.f32 %v3928_v12, %v3967_v26 }
  0xae   : > { %649 = vrot.lane.b32.xlu2 %v3947_v20, %s3740_s27  ;;  %v3023_v37 = vpack.i.bf16 %v688_v30, %v687_v33  ;;  %v3065_v57 = vpack.i.bf16 %v3947_v20, %v3947_v20 }
  0xaf   : > { %v3028_v35 = vpack.i.bf16 %v640_v28, %v639_v31  ;;  %v725_v28 = vld [vmem:[%s5062_s4] sm:$0xff]  ;;  %v670_v31 = vsel %vm669_vm6, %v3021_v4, %v3022_v3 }
  0xb2   : > { %v3958_v23 = vpop.permute.xlu0 %567 }
  0xb3   : > { %v3960_v24 = vpop.permute.xlu1 %569  ;;  %v4015_v42 = vmul.f32 0.0, %v3958_v23 }
  0xb4   : > { %v578_v25 = vmul.f32 %v3928_v12, %v3960_v24  ;;  %v3999_v38 = vsel %vm571_vm3, %v3958_v23, %v3960_v24 }
  0xb5   : > { %620 = vrot.lane.b32.xlu1 %v3956_v22, %s3739_s24  ;;  %v577_v43 = vmul.f32 %v3926_v11, %v3999_v38 }
  0xb6   : > { %586 = vrot.lane.b32.xlu0 %v578_v25, %s3737_s3  ;;  %v726_v25 = vld [vmem:[%s5062_s4 + $0x8] sm:$0xff] }
  0xb7   : > { %v3043_v50 = vpack.i.bf16 %v577_v43, %v4015_v42 }
  0xba   : > { %v3985_v32 = vpop.permute.xlu0 %538 }
  0xbb   : > { %v547_v34 = vmul.f32 %v3928_v12, %v3985_v32  ;;  %v3994_v36 = vsel %vm540_vm2, %v3979_v29, %v3985_v32  ;;  %v4021_v45 = vpop.permute.xlu1 %483 }
  0xbc   : > { %v546_v41 = vmul.f32 %v3926_v11, %v3994_v36  ;;  %v4031_v49 = vsel %vm487_vm5, %v4021_v45, %v4019_v44  ;;  %v4037_v52 = vmul.f32 0.0, %v4021_v45 }
  0xbd   : > { %555 = vrot.lane.b32.xlu2 %v547_v34, %s3738_s21  ;;  %3029 = vrot.lane.b32.xlu1 %v3028_v35, %s3740_s27  ;;  %v493_v53 = vmul.f32 %v3926_v11, %v4031_v49  ;;  %v3745_v34 = vmov 0  }
  0xbe   : > { %3024 = vrot.lane.b32.xlu0 %v3023_v37, %s3741_s30  ;;  %v3048_v48 = vpack.i.bf16 %v546_v41, %v4009_v40  ;;  %3058 = vset.pattern.permute.xlu1 %v3745_v34 }
  0xbf   : > { %v3053_v54 = vpack.i.bf16 %v493_v53, %v4037_v52  ;;  %3059 = vset.pattern.permute.xlu2 %v3745_v34  ;;  %3180 = vset.pattern.permute.xlu0 %v3745_v34 }
  0xc2   : > { %v668_v59 = vpop.permute.xlu0 %667 }
  0xc3   : > { %v671_v33 = vsel %vm669_vm6, %v3022_v3, %v668_v59 }
  0xc5   : > { %3044 = vrot.lane.b32.xlu2 %v3043_v50, %s3737_s3  ;;  %3049 = vrot.lane.b32.xlu1 %v3048_v48, %s3738_s21 }
  0xc6   : > { %3034 = vrot.lane.b32.xlu0 %v3033_v51, %s3739_s24 }
  0xcd   : > { %521 = vrot.lane.b32.xlu1 %v3928_v12, %s3744_s14  ;;  %3054 = vrot.lane.b32.xlu2 %v3053_v54, %s3736_s0 }
  0xce   : > { %3039 = vrot.lane.b32.xlu0 %v3038_v55, %s3744_s14 }
  0xd5   : > { %734 = vperm.xlu1 %3058, %v726_v25   ;;  %729 = vperm.xlu2 %3059, %v725_v28  }
  0xd6   : > { %502 = vrot.lane.b32.xlu0 %v494_v56, %s3736_s0 }
  0xdd   : > { %3061 = vrot.lane.b32.xlu1 %v3742_v8, %s3743_s23 }
  0xde   : > { %3066 = vrot.lane.b32.xlu0 %v3065_v57, %s3740_s27 }
 0x108   : > { %v650_v61 = vpop.permute.xlu2 %649 }
 0x117   : > { %v556_v0 = vpop.permute.xlu2 %555 }
 0x11f   : > { %v698_v60 = vpop.permute.xlu1 %697  ;;  %v3045_v30 = vpop.permute.xlu2 %3044 }
 0x120   : > { %v3047_v48 = vunpack.i.h.bf16 %v3045_v30  ;;  %v3046_v50 = vunpack.i.l.bf16 %v3045_v30 }
 0x122   : > { %v589_v57 = vsel %vm588_vm4, %v3046_v50, %v3047_v48 }
 0x127   : > { %v621_v62 = vpop.permute.xlu1 %620  ;;  %v3055_v55 = vpop.permute.xlu2 %3054 }
 0x128   : > { %v587_v63 = vpop.permute.xlu0 %586 }
 0x129   : > { %v590_v58 = vsel %vm588_vm4, %v3047_v48, %v587_v63  ;;  %v705_v63 = vld [vmem:[#allocation10] sm:$0xff] }
 0x12f   : > { %v3030_v1 = vpop.permute.xlu1 %3029 }
 0x130   : > { %v3025_v2 = vpop.permute.xlu0 %3024  ;;  %v3032_v7 = vunpack.i.h.bf16 %v3030_v1  ;;  %v3031_v9 = vunpack.i.l.bf16 %v3030_v1 }
 0x131   : > { %v3027_v5 = vunpack.i.h.bf16 %v3025_v2  ;;  %v3026_v6 = vunpack.i.l.bf16 %v3025_v2 }
 0x132   : > { %v651_v35 = vsel %vm540_vm2, %v3031_v9, %v3032_v7  ;;  %v652_v37 = vsel %vm540_vm2, %v3032_v7, %v650_v61  ;;  %v730_v9 = vpop.permute.xlu2 %729 }
 0x133   : > { %v699_v10 = vsel %vm487_vm5, %v3026_v6, %v3027_v5  ;;  %v700_v13 = vsel %vm487_vm5, %v3027_v5, %v698_v60  ;;  %v3057_v60 = vunpack.i.h.bf16 %v3055_v55 }
 0x134   : > { %751 = vmatpush.msra.mxu0 %v699_v10  ;;  %774 = vmatpush.msra.mxu1 %v700_v13  ;;  %v795_v13 = vstv %s790_s12 }
 0x136   : > { %752 = vmatpush.msra.mxu0 %v670_v31  ;;  %775 = vmatpush.msra.mxu1 %v671_v33 }
 0x137   : > { %v3050_v43 = vpop.permute.xlu1 %3049 }
 0x138   : > { %753 = vmatpush.msra.mxu0 %v651_v35  ;;  %776 = vmatpush.msra.mxu1 %v652_v37  ;;  %v3035_v41 = vpop.permute.xlu0 %3034  ;;  %v3051_v51 = vunpack.i.l.bf16 %v3050_v43  ;;  %v3052_v56 = vunpack.i.h.bf16 %v3050_v43 }
 0x139   : > { %v3037_v46 = vunpack.i.h.bf16 %v3035_v41  ;;  %v3036_v47 = vunpack.i.l.bf16 %v3035_v41 }
 0x13a   : > { %v558_v59 = vsel %vm557_vm0, %v3051_v51, %v3052_v56  ;;  %v559_v4 = vsel %vm557_vm0, %v3052_v56, %v556_v0  ;;  %v706_v0 = vld [vmem:[#allocation10 + $0x8] sm:$0xff] }
 0x13b   : > { %v622_v53 = vsel %vm571_vm3, %v3036_v47, %v3037_v46  ;;  %v623_v54 = vsel %vm571_vm3, %v3037_v46, %v621_v62  ;;  %v3056_v62 = vunpack.i.l.bf16 %v3055_v55 }
 0x13c   : > { %754 = vmatpush.msra.mxu0 %v622_v53  ;;  %777 = vmatpush.msra.mxu1 %v623_v54 }
 0x13d   : > { %v505_v5 = vsel %vm504_vm1, %v3056_v62, %v3057_v60 }
 0x13e   : > { %755 = vmatpush.msra.mxu0 %v3926_v11  ;;  %778 = vmatpush.msra.mxu1 %v3928_v12 }
 0x13f   : > { %v522_v1 = vpop.permute.xlu1 %521 }
 0x140   : > { %756 = vmatpush.msra.mxu0 %v589_v57  ;;  %779 = vmatpush.msra.mxu1 %v590_v58  ;;  %v3040_v61 = vpop.permute.xlu0 %3039 }
 0x141   : > { %v3042_v2 = vunpack.i.h.bf16 %v3040_v61  ;;  %v3041_v3 = vunpack.i.l.bf16 %v3040_v61 }
 0x142   : > { %757 = vmatpush.msra.mxu0 %v558_v59  ;;  %780 = vmatpush.msra.mxu1 %v559_v4 }
 0x143   : > { %v524_v11 = vsel %vm523_vm7, %v3041_v3, %v3042_v2  ;;  %v525_v12 = vsel %vm523_vm7, %v3042_v2, %v522_v1 }
 0x144   : > { %758 = vmatpush.msra.mxu0 %v524_v11  ;;  %781 = vmatpush.msra.mxu1 %v525_v12 }
 0x146   : > { %759 = vmatpush.msra.mxu0 %v505_v5 }
 0x147   : > { %2895 = vmatmul.msk.f32.vlgmr.msra.gmra.mxu0 %vm737_vm8, %v705_v63  ;;  %v735_v33 = vpop.permute.xlu1 %734 }
 0x148   : > { %v503_v6 = vpop.permute.xlu0 %502 }
 0x149   : > { %v506_v7 = vsel %vm504_vm1, %v3057_v60, %v503_v6 }
 0x14a   : > { %782 = vmatpush.msra.mxu1 %v506_v7 }
 0x14b   : > { %2897 = vmatmul.msk.f32.vlgmr.msra.gmra.mxu1 %vm737_vm8, %v705_v63 }
 0x14f   : > { %2896 = vmatmul.msk.f32.gmra.mxu0 %vm737_vm8, %v706_v0 }
 0x153   : > { %2898 = vmatmul.msk.f32.gmra.mxu1 %vm737_vm8, %v706_v0 }
 0x1c4   : > { %v761_v10 = vpop.f32.mrf.mxu0 }
 0x1c5   : > { %v762_v25 = vadd.f32 %v761_v10, %v730_v9 }
 0x1c7   : > { %v796_v28 = vmul.f32 %v795_v13, %v762_v25  ;;  %vm791_vm9 = vcmp.ge.f32.partialorder %v762_v25, 0.0 }
 0x1c8   : > { %v784_v30 = vpop.f32.mrf.mxu1 }
 0x1c9   : > { %v785_v31 = vadd.f32 %v784_v30, %v730_v9  ;;  %v4081_v34 = vsel %vm791_vm9, %v762_v25, %v796_v28  ;;  %v3100_v25 = vpack.i.bf16 %v3956_v22, %v3956_v22 }
 0x1ca   : > { %v1104_v47 = vmul.f32 %v4081_v34, %v3933_v14  ;;  %v1026_v57 = vmul.f32 %v4081_v34, %v3935_v15  ;;  %v984_v62 = vmul.f32 %v4081_v34, %v3937_v16  ;;  %v935_v4 = vmul.f32 %v4081_v34, %v3999_v38 }
 0x1cb   : > { %vm792_vm10 = vcmp.ge.f32.partialorder %v785_v31, 0.0  ;;  %v797_v35 = vmul.f32 %v795_v13, %v785_v31 }
 0x1cc   : > { %v764_v37 = vpop.f32.mrf.mxu0  ;;  %v3105_v63 = vpack.i.bf16 %v935_v4, %v4015_v42  ;;  %v1184_v4 = vld [vmem:[%s5064_s6] sm:$0xff] }
 0x1cd   : > { %v4083_v41 = vsel %vm792_vm10, %v785_v31, %v797_v35  ;;  %v765_v43 = vadd.f32 %v764_v37, %v735_v33  ;;  %v893_v35 = vmul.f32 %v4081_v34, %v3994_v36 }
 0x1ce   : > { %v3070_v46 = vpack.i.bf16 %v4083_v41, %v4081_v34  ;;  %v1105_v48 = vmul.f32 %v4083_v41, %v3974_v27  ;;  %v1027_v55 = vmul.f32 %v4083_v41, %v3967_v26  ;;  %v985_v58 = vmul.f32 %v4083_v41, %v4006_v39 }
 0x1cf   : > { %v798_v53 = vmul.f32 %v795_v13, %v765_v43  ;;  %vm793_vm11 = vcmp.ge.f32.partialorder %v765_v43, 0.0  ;;  %v936_v31 = vmul.f32 %v4083_v41, %v3960_v24 }
 0x1d0   : > { %v787_v50 = vpop.f32.mrf.mxu1  ;;  %3071 = vrot.lane.b32.xlu1 %v3070_v46, %s3743_s23  ;;  %v3080_v51 = vpack.i.bf16 %v1105_v48, %v1104_v47  ;;  %v3075_v1 = vpack.i.bf16 %v1027_v55, %v1026_v57  ;;  %v3085_v2 = vpack.i.bf16 %v985_v58, %v984_v62  ;;  %v3110_v46 = vpack.i.bf16 %v893_v35, %v4009_v40  ;;  %v1186_v62 = vld [vmem:[%s5064_s6 + $0x10] sm:$0xff] }
 0x1d1   : > { %v788_v54 = vadd.f32 %v787_v50, %v735_v33  ;;  %v4099_v59 = vsel %vm793_vm11, %v765_v43, %v798_v53  ;;  %v894_v48 = vmul.f32 %v4083_v41, %v3985_v32  ;;  %v3130_v53 = vpack.i.bf16 %v4081_v34, %v3742_v8 }
 0x1d2   : > { %3081 = vrot.lane.b32.xlu2 %v3080_v51, %s3741_s30  ;;  %v938_v3 = vmul.f32 %v4099_v59, %v3999_v38  ;;  %v1029_v5 = vmul.f32 %v4099_v59, %v3935_v15  ;;  %v896_v7 = vmul.f32 %v4099_v59, %v3994_v36  ;;  %v1107_v9 = vmul.f32 %v4099_v59, %v3933_v14 }
 0x1d3   : > { %vm794_vm12 = vcmp.ge.f32.partialorder %v788_v54, 0.0  ;;  %v799_v56 = vmul.f32 %v795_v13, %v788_v54  ;;  %v987_v33 = vmul.f32 %v4099_v59, %v3937_v16  ;;  %v3125_v51 = vpack.i.bf16 %v4099_v59, %v3742_v8 }
 0x1d4   : > { %v3140_v12 = vpack.i.bf16 %v938_v3, %v4015_v42  ;;  %v3145_v10 = vpack.i.bf16 %v896_v7, %v4009_v40  ;;  %v818_v55 = vmul.f32 %v4099_v59, %v4031_v49  ;;  %v815_v57 = vmul.f32 %v4081_v34, %v4031_v49  ;;  %v4192_v7 = vpop.permute.xlu0 %3066 }
 0x1d5   : > { %v4101_v60 = vsel %vm794_vm12, %v788_v54, %v799_v56  ;;  %v816_v56 = vmul.f32 %v4083_v41, %v4019_v44  ;;  %v3175_v3 = vpack.i.bf16 %v3944_v19, %v3944_v19 }
 0x1d6   : > { %v3090_v61 = vpack.i.bf16 %v4101_v60, %v4099_v59  ;;  %v1030_v11 = vmul.f32 %v4101_v60, %v3967_v26  ;;  %v1108_v0 = vmul.f32 %v4101_v60, %v3974_v27  ;;  %v939_v28 = vmul.f32 %v4101_v60, %v3960_v24 }
 0x1d7   : > { %v988_v30 = vmul.f32 %v4101_v60, %v4006_v39  ;;  %v897_v47 = vmul.f32 %v4101_v60, %v3985_v32  ;;  %v819_v54 = vmul.f32 %v4101_v60, %v4019_v44 }
 0x1d8   : > { %3091 = vrot.lane.b32.xlu0 %v3090_v61, %s3743_s23  ;;  %3076 = vrot.lane.b32.xlu1 %v3075_v1, %s3740_s27  ;;  %v3095_v6 = vpack.i.bf16 %v1030_v11, %v1029_v5  ;;  %v3115_v13 = vpack.i.bf16 %v1108_v0, %v1107_v9  ;;  %v3150_v37 = vpack.i.bf16 %v936_v31, %v939_v28  ;;  %v1185_v11 = vld [vmem:[%s5064_s6 + $0x8] sm:$0xff]  ;;  %v3062_v5 = vpop.permute.xlu1 %3061 }
 0x1d9   : > { %v3120_v43 = vpack.i.bf16 %v988_v30, %v987_v33  ;;  %v3165_v50 = vpack.i.bf16 %v894_v48, %v897_v47  ;;  %v3170_v58 = vpack.i.bf16 %v816_v56, %v819_v54  ;;  %v3155_v61 = vpack.i.bf16 %v818_v55, %v4037_v52 }
 0x1da   : > { %3086 = vrot.lane.b32.xlu2 %v3085_v2, %s3739_s24  ;;  %v3135_v1 = vpack.i.bf16 %v815_v57, %v4037_v52  ;;  %v3160_v2 = vpack.i.bf16 %v4083_v41, %v4101_v60 }
 0x1e0   : > { %3141 = vrot.lane.b32.xlu1 %v3140_v12, %s3737_s3  ;;  %3106 = vrot.lane.b32.xlu0 %v3105_v63, %s3737_s3 }
 0x1e2   : > { %3096 = vrot.lane.b32.xlu2 %v3095_v6, %s3740_s27 }
 0x1e8   : > { %3146 = vrot.lane.b32.xlu1 %v3145_v10, %s3738_s21  ;;  %3116 = vrot.lane.b32.xlu0 %v3115_v13, %s3741_s30 }
 0x1ea   : > { %3101 = vrot.lane.b32.xlu2 %v3100_v25, %s3739_s24 }
 0x1f0   : > { %3151 = vrot.lane.b32.xlu1 %v3150_v37, %s3737_s3  ;;  %3121 = vrot.lane.b32.xlu0 %v3120_v43, %s3739_s24 }
 0x1f2   : > { %3111 = vrot.lane.b32.xlu2 %v3110_v46, %s3738_s21 }
 0x1f8   : > { %3166 = vrot.lane.b32.xlu1 %v3165_v50, %s3738_s21  ;;  %3126 = vrot.lane.b32.xlu0 %v3125_v51, %s3744_s14 }
 0x1fa   : > { %3131 = vrot.lane.b32.xlu2 %v3130_v53, %s3744_s14 }
 0x200   : > { %3171 = vrot.lane.b32.xlu1 %v3170_v58, %s3736_s0  ;;  %3156 = vrot.lane.b32.xlu0 %v3155_v61, %s3736_s0 }
 0x202   : > { %3136 = vrot.lane.b32.xlu2 %v3135_v1, %s3736_s0 }
 0x208   : > { %1200 = vperm.xlu1 %3058, %v1186_v62   ;;  %3161 = vrot.lane.b32.xlu0 %v3160_v2, %s3744_s14 }
 0x20a   : > { %3176 = vrot.lane.b32.xlu2 %v3175_v3, %s3741_s30 }
 0x210   : > { %1190 = vperm.xlu1 %3058, %v1184_v4   ;;  %v3064_v4 = vunpack.i.h.bf16 %v3062_v5 }
 0x212   : > { %1195 = vperm.xlu2 %3059, %v1185_v11   ;;  %v3063_v11 = vunpack.i.l.bf16 %v3062_v5 }
 0x22c   : > { %v4188_v12 = vpop.permute.xlu2 %3081 }
 0x22d   : > { %v3084_v58 = vunpack.i.h.bf16 %v4188_v12  ;;  %v3083_v61 = vunpack.i.l.bf16 %v4188_v12 }
 0x234   : > { %v4190_v63 = vpop.permute.xlu2 %3086 }
 0x23c   : > { %v3097_v6 = vpop.permute.xlu2 %3096 }
 0x23d   : > { %v3099_v35 = vunpack.i.h.bf16 %v3097_v6  ;;  %v3098_v37 = vunpack.i.l.bf16 %v3097_v6  ;;  %v1128_v6 = vsel %vm487_vm5, %v3083_v61, %v3084_v58 }
 0x23f   : > { %v1052_v50 = vsel %vm540_vm2, %v3098_v37, %v3099_v35  ;;  %v3088_v37 = vunpack.i.l.bf16 %v4190_v63 }
 0x242   : > { %v3072_v0 = vpop.permute.xlu1 %3071 }
 0x243   : > { %v3074_v25 = vunpack.i.h.bf16 %v3072_v0  ;;  %v3073_v28 = vunpack.i.l.bf16 %v3072_v0  ;;  %v1141_v0 = vld [vmem:[#allocation12 + $0x8] sm:$0xff] }
 0x244   : > { %v4194_v9 = vpop.permute.xlu2 %3101 }
 0x245   : > { %v1086_v48 = vsel %vm669_vm6, %v3073_v28, %v3074_v25  ;;  %v1087_v12 = vsel %vm669_vm6, %v3074_v25, %v3064_v4  ;;  %v3104_v61 = vunpack.i.h.bf16 %v4194_v9 }
 0x24a   : > { %v3092_v10 = vpop.permute.xlu0 %3091  ;;  %v3077_v13 = vpop.permute.xlu1 %3076 }
 0x24b   : > { %v3094_v30 = vunpack.i.h.bf16 %v3092_v10  ;;  %v3093_v31 = vunpack.i.l.bf16 %v3092_v10  ;;  %v3079_v46 = vunpack.i.h.bf16 %v3077_v13  ;;  %v3078_v47 = vunpack.i.l.bf16 %v3077_v13 }
 0x24c   : > { %v4196_v33 = vpop.permute.xlu2 %3111  ;;  %v3068_v13 = vunpack.i.l.bf16 %v4192_v7 }
 0x24d   : > { %v1088_v43 = vsel %vm669_vm6, %v3093_v31, %v3094_v30  ;;  %v1050_v54 = vsel %vm540_vm2, %v3078_v47, %v3079_v46  ;;  %v1089_v10 = vsel %vm669_vm6, %v3094_v30, %v3063_v11  ;;  %v3089_v31 = vunpack.i.h.bf16 %v4190_v63 }
 0x24e   : > { %1220 = vmatpush.msra.mxu2 %v1088_v43  ;;  %v1053_v30 = vsel %vm540_vm2, %v3099_v35, %v3068_v13 }
 0x250   : > { %1221 = vmatpush.msra.mxu2 %v1086_v48  ;;  %v3069_v48 = vunpack.i.h.bf16 %v4192_v7 }
 0x252   : > { %v4201_v51 = vpop.permute.xlu1 %3141  ;;  %1222 = vmatpush.msra.mxu2 %v1052_v50  ;;  %v4203_v53 = vpop.permute.xlu0 %3106  ;;  %v1051_v63 = vsel %vm540_vm2, %v3079_v46, %v3069_v48  ;;  %v1009_v46 = vsel %vm571_vm3, %v3089_v31, %v3104_v61 }
 0x253   : > { %v3144_v4 = vunpack.i.h.bf16 %v4201_v51  ;;  %v3143_v11 = vunpack.i.l.bf16 %v4201_v51  ;;  %v3108_v13 = vunpack.i.l.bf16 %v4203_v53 }
 0x254   : > { %1223 = vmatpush.msra.mxu2 %v1050_v54  ;;  %v4206_v55 = vpop.permute.xlu2 %3131 }
 0x25a   : > { %v4208_v56 = vpop.permute.xlu1 %3146  ;;  %v3117_v57 = vpop.permute.xlu0 %3116 }
 0x25b   : > { %v3119_v1 = vunpack.i.h.bf16 %v3117_v57  ;;  %v3118_v62 = vunpack.i.l.bf16 %v3117_v57  ;;  %v3149_v51 = vunpack.i.h.bf16 %v4208_v56 }
 0x25c   : > { %v4212_v2 = vpop.permute.xlu2 %3136 }
 0x25d   : > { %v1130_v3 = vsel %vm487_vm5, %v3118_v62, %v3119_v1  ;;  %v3103_v62 = vunpack.i.l.bf16 %v4194_v9  ;;  %v1143_v9 = vld [vmem:[#allocation12 + $0x18] sm:$0xff] }
 0x25e   : > { %1263 = vmatpush.msra.mxu3 %v1130_v3  ;;  %v1008_v3 = vsel %vm571_vm3, %v3088_v37, %v3089_v31 }
 0x260   : > { %1264 = vmatpush.msra.mxu3 %v1128_v6 }
 0x261   : > { %2899 = vmatmul.msk.f32.vlgmr.msra.gmra.mxu3 %vm523_vm7, %v1141_v0 }
 0x262   : > { %1278 = vmatpush.msrb.mxu3 %v1089_v10  ;;  %v3122_v28 = vpop.permute.xlu0 %3121  ;;  %v3152_v5 = vpop.permute.xlu1 %3151 }
 0x263   : > { %v3124_v43 = vunpack.i.h.bf16 %v3122_v28  ;;  %v3123_v47 = vunpack.i.l.bf16 %v3122_v28  ;;  %v3153_v28 = vunpack.i.l.bf16 %v3152_v5  ;;  %v3154_v31 = vunpack.i.h.bf16 %v3152_v5 }
 0x264   : > { %1279 = vmatpush.msrb.mxu3 %v1087_v12  ;;  %v3177_v50 = vpop.permute.xlu2 %3176  ;;  %v960_v12 = vsel %vm588_vm4, %v3143_v11, %v3144_v4 }
 0x265   : > { %v3179_v54 = vunpack.i.h.bf16 %v3177_v50  ;;  %v3178_v57 = vunpack.i.l.bf16 %v3177_v50  ;;  %v1010_v25 = vsel %vm571_vm3, %v3123_v47, %v3124_v43  ;;  %v1011_v35 = vsel %vm571_vm3, %v3124_v43, %v3103_v62  ;;  %v1145_v47 = vld [vmem:[#allocation12 + $0x28] sm:$0xff] }
 0x266   : > { %1280 = vmatpush.msrb.mxu3 %v1053_v30  ;;  %1224 = vmatpush.msra.mxu2 %v1010_v25  ;;  %v961_v43 = vsel %vm588_vm4, %v3144_v4, %v3153_v28  ;;  %v3133_v30 = vunpack.i.l.bf16 %v4206_v55  ;;  %v1147_v4 = vld [vmem:[#allocation12 + $0x38] sm:$0xff] }
 0x267   : > { %v1131_v7 = vsel %vm487_vm5, %v3119_v1, %v3178_v57  ;;  %v1129_v6 = vsel %vm487_vm5, %v3084_v58, %v3179_v54  ;;  %v3109_v1 = vunpack.i.h.bf16 %v4203_v53  ;;  %v3148_v58 = vunpack.i.l.bf16 %v4208_v56  ;;  %v1187_v28 = vld [vmem:[%s5064_s6 + $0x18] sm:$0xff] }
 0x268   : > { %1281 = vmatpush.msrb.mxu3 %v1051_v63  ;;  %1225 = vmatpush.msra.mxu2 %v1008_v3  ;;  %v3114_v53 = vunpack.i.h.bf16 %v4196_v33  ;;  %v3138_v3 = vunpack.i.l.bf16 %v4212_v2 }
 0x269   : > { %1321 = vmatpush.msrb.mxu0 %v1131_v7  ;;  %2900 = vmatmul.msk.f32.gmra.mxu3 %vm523_vm7, %v1143_v9  ;;  %v918_v5 = vsel %vm557_vm0, %v3148_v58, %v3149_v51 }
 0x26a   : > { %1282 = vmatpush.msrb.mxu3 %v1011_v35  ;;  %v4234_v10 = vpop.permute.xlu0 %3126  ;;  %1226 = vmatpush.msra.mxu2 %v4099_v59  ;;  %v3167_v59 = vpop.permute.xlu1 %3166 }
 0x26b   : > { %1322 = vmatpush.msrb.mxu0 %v1129_v6  ;;  %v3168_v37 = vunpack.i.l.bf16 %v3167_v59  ;;  %v3129_v56 = vunpack.i.h.bf16 %v4234_v10  ;;  %v3169_v48 = vunpack.i.h.bf16 %v3167_v59  ;;  %1205 = vperm.xlu0 %3180, %v1187_v28  }
 0x26c   : > { %1283 = vmatpush.msrb.mxu3 %v1009_v46  ;;  %2903 = vmatmul.msk.f32.vlgmr.msrb.gmra.mxu0 %vm523_vm7, %v1141_v0  ;;  %v3113_v0 = vunpack.i.l.bf16 %v4196_v33  ;;  %v959_v33 = vsel %vm588_vm4, %v3109_v1, %v3154_v31 }
 0x26d   : > { %1227 = vmatpush.msra.mxu2 %v4081_v34  ;;  %v958_v34 = vsel %vm588_vm4, %v3108_v13, %v3109_v1  ;;  %v919_v57 = vsel %vm557_vm0, %v3149_v51, %v3168_v37  ;;  %v917_v63 = vsel %vm557_vm0, %v3114_v53, %v3169_v48 }
 0x26e   : > { %1284 = vmatpush.msrb.mxu3 %v4101_v60  ;;  %v3128_v60 = vunpack.i.l.bf16 %v4234_v10  ;;  %v916_v54 = vsel %vm557_vm0, %v3113_v0, %v3114_v53  ;;  %v1144_v53 = vld [vmem:[#allocation12 + $0x20] sm:$0xff]  ;;  %v1146_v0 = vld [vmem:[#allocation12 + $0x30] sm:$0xff] }
 0x26f   : > { %1228 = vmatpush.msra.mxu2 %v960_v12  ;;  %v1142_v12 = vld [vmem:[#allocation12 + $0x10] sm:$0xff] }
 0x270   : > { %1285 = vmatpush.msrb.mxu3 %v4083_v41  ;;  %v3134_v41 = vunpack.i.h.bf16 %v4206_v55  ;;  %v876_v62 = vsel %vm523_vm7, %v3128_v60, %v3129_v56  ;;  %v3139_v55 = vunpack.i.h.bf16 %v4212_v2 }
 0x271   : > { %1229 = vmatpush.msra.mxu2 %v958_v34  ;;  %2901 = vmatmul.msk.f32.gmra.mxu3 %vm523_vm7, %v1145_v47 }
 0x272   : > { %1286 = vmatpush.msrb.mxu3 %v961_v43  ;;  %v3157_v50 = vpop.permute.xlu0 %3156  ;;  %v874_v7 = vsel %vm523_vm7, %v3133_v30, %v3134_v41  ;;  %v3172_v11 = vpop.permute.xlu1 %3171  ;;  %v838_v1 = vsel %vm504_vm1, %v3138_v3, %v3139_v55 }
 0x273   : > { %1230 = vmatpush.msra.mxu2 %v918_v5  ;;  %v3159_v25 = vunpack.i.h.bf16 %v3157_v50  ;;  %v3158_v61 = vunpack.i.l.bf16 %v3157_v50  ;;  %v3173_v2 = vunpack.i.l.bf16 %v3172_v11  ;;  %v3174_v51 = vunpack.i.h.bf16 %v3172_v11 }
 0x274   : > { %1287 = vmatpush.msrb.mxu3 %v959_v33  ;;  %2904 = vmatmul.msk.f32.gmra.mxu0 %vm523_vm7, %v1143_v9  ;;  %v1140_v9 = vld [vmem:[#allocation12] sm:$0xff]  ;;  %v4283_v50 = vstv %s2907_s13 }
 0x275   : > { %1231 = vmatpush.msra.mxu2 %v916_v54  ;;  %v840_v35 = vsel %vm504_vm1, %v3158_v61, %v3159_v25  ;;  %v841_v59 = vsel %vm504_vm1, %v3159_v25, %v3173_v2  ;;  %v839_v31 = vsel %vm504_vm1, %v3139_v55, %v3174_v51  ;;  %v1196_v54 = vpop.permute.xlu2 %1195 }
 0x276   : > { %1288 = vmatpush.msrb.mxu3 %v919_v57 }
 0x277   : > { %1232 = vmatpush.msra.mxu2 %v876_v62 }
 0x278   : > { %1289 = vmatpush.msrb.mxu3 %v917_v63 }
 0x279   : > { %1233 = vmatpush.msra.mxu2 %v874_v7  ;;  %2902 = vmatmul.msk.f32.gmra.mxu3 %vm523_vm7, %v1147_v4 }
 0x27a   : > { %v3162_v6 = vpop.permute.xlu0 %3161  ;;  %v4279_v43 = vpop.permute.xlu1 %1200 }
 0x27b   : > { %1234 = vmatpush.msra.mxu2 %v840_v35  ;;  %v3164_v10 = vunpack.i.h.bf16 %v3162_v6  ;;  %v3163_v46 = vunpack.i.l.bf16 %v3162_v6 }
 0x27c   : > { %2905 = vmatmul.msk.f32.gmra.mxu0 %vm523_vm7, %v1145_v47 }
 0x27d   : > { %1235 = vmatpush.msra.mxu2 %v838_v1  ;;  %v877_v13 = vsel %vm523_vm7, %v3129_v56, %v3163_v46  ;;  %v875_v58 = vsel %vm523_vm7, %v3134_v41, %v3164_v10 }
 0x27e   : > { %1236 = vmatmul.f32.vlgmr.msra.gmra.mxu2 %v1140_v9  ;;  %1290 = vmatpush.msrb.mxu3 %v877_v13 }
 0x280   : > { %1291 = vmatpush.msrb.mxu3 %v875_v58 }
 0x282   : > { %1292 = vmatpush.msrb.mxu3 %v841_v59  ;;  %v1191_v5 = vpop.permute.xlu1 %1190 }
 0x284   : > { %2906 = vmatmul.msk.f32.gmra.mxu0 %vm523_vm7, %v1147_v4  ;;  %1293 = vmatpush.msrb.mxu3 %v839_v31 }
 0x285   : > { %1294 = vmatmul.f32.vlgmr.msrb.gmra.mxu3 %v1140_v9 }
 0x286   : > { %1239 = vmatmul.f32.gmra.mxu2 %v1142_v12 }
 0x28d   : > { %1297 = vmatmul.f32.gmra.mxu3 %v1142_v12 }
 0x28e   : > { %1242 = vmatmul.f32.gmra.mxu2 %v1144_v53 }
 0x295   : > { %1300 = vmatmul.f32.gmra.mxu3 %v1144_v53 }
 0x296   : > { %1245 = vmatmul.f32.gmra.mxu2 %v1146_v0 }
 0x29d   : > { %1303 = vmatmul.f32.gmra.mxu3 %v1146_v0 }
 0x2e4   : > { %v1266_v34 = vpop.f32.mrf.mxu3 }
 0x2e9   : > { %v1324_v33 = vpop.f32.mrf.mxu0 }
 0x2ec   : > { %v1269_v37 = vpop.f32.mrf.mxu3 }
 0x2f1   : > { %v1327_v35 = vpop.f32.mrf.mxu0 }
 0x2f4   : > { %v1272_v56 = vpop.f32.mrf.mxu3 }
 0x2fc   : > { %v4281_v60 = vpop.f32.mrf.mxu3 }
 0x301   : > { %v1237_v47 = vpop.f32.mrf.mxu2 }
 0x302   : > { %v1238_v48 = vadd.f32 %v1237_v47, %v1191_v5  ;;  %v1330_v47 = vpop.f32.mrf.mxu0 }
 0x304   : > { %v1267_v41 = vadd.f32 %v1266_v34, %v1238_v48 }
 0x306   : > { %vm1337_vm13 = vcmp.ge.f32.partialorder %v1267_v41, 0.0  ;;  %v1346_v30 = vmul.f32 %v4283_v50, %v1267_v41 }
 0x308   : > { %v4286_v57 = vsel %vm1337_vm13, %v1267_v41, %v1346_v30  ;;  %v1295_v61 = vpop.f32.mrf.mxu3  ;;  %vm2124_vm13 = vcmask 261120  }
 0x309   : > { %1362 = vst [vmem:[#allocation2] sm:$0xff] %v4286_v57  ;;  %v1240_v25 = vpop.f32.mrf.mxu2  ;;  %v3181_v62 = vpack.i.bf16 %v4286_v57, %v3742_v8  ;;  %v1296_v55 = vadd.f32 %v1295_v61, %v1191_v5  ;;  %v1623_v4 = vmul.f32 %v4286_v57, %v3999_v38  ;;  %v1539_v12 = vmul.f32 %v4286_v57, %v3994_v36  ;;  %v1206_v5 = vpop.permute.xlu0 %1205 }
 0x30a   : > { %v1241_v63 = vadd.f32 %v1240_v25, %v1196_v54  ;;  %v4318_v0 = vmul.f32 %v4286_v57, %v3935_v15 }
 0x30b   : > { %3182 = vrot.lane.b32.xlu2 %v3181_v62, %s3744_s14  ;;  %v1325_v7 = vadd.f32 %v1324_v33, %v1296_v55  ;;  %v3186_v51 = vpack.i.bf16 %v1623_v4, %v4015_v42  ;;  %v3191_v55 = vpack.i.bf16 %v1539_v12, %v4009_v40  ;;  %v4352_v4 = vmul.f32 %v4286_v57, %v3937_v16 }
 0x30c   : > { %v1270_v3 = vadd.f32 %v1269_v37, %v1241_v63 }
 0x30d   : > { %vm1338_vm15 = vcmp.ge.f32.partialorder %v1325_v7, 0.0  ;;  %v1347_v6 = vmul.f32 %v4283_v50, %v1325_v7 }
 0x30e   : > { %vm1339_vm14 = vcmp.ge.f32.partialorder %v1270_v3, 0.0  ;;  %v1348_v11 = vmul.f32 %v4283_v50, %v1270_v3 }
 0x30f   : > { %v4298_v10 = vsel %vm1338_vm15, %v1325_v7, %v1347_v6 }
 0x310   : > { %v4296_v9 = vsel %vm1339_vm14, %v1270_v3, %v1348_v11  ;;  %v1298_v46 = vpop.f32.mrf.mxu3  ;;  %v3201_v1 = vpack.i.bf16 0.0, %v4298_v10  ;;  %1363 = vst [vmem:[#allocation2 + $0x58] sm:$0xff] %v4298_v10  ;;  %v1807_v31 = vmul.f32 %v4298_v10, %v3967_v26 }
 0x311   : > { %1364 = vst [vmem:[#allocation2 + $0x68] sm:$0xff] %v4296_v9  ;;  %v1243_v8 = vpop.f32.mrf.mxu2  ;;  %v3211_v2 = vpack.i.bf16 %v4286_v57, %v4296_v9  ;;  %v1299_v28 = vadd.f32 %v1298_v46, %v1196_v54  ;;  %v1626_v53 = vmul.f32 %v4296_v9, %v3999_v38  ;;  %v4322_v34 = vmul.f32 %v4296_v9, %v3935_v15 }
 0x312   : > { %v1244_v13 = vadd.f32 %v1243_v8, %v4279_v43  ;;  %3202 = vrot.lane.b32.xlu0 %v3201_v1, %s3743_s23  ;;  %v3216_v25 = vpack.i.bf16 %v3947_v20, %v1807_v31  ;;  %v4344_v20 = vmul.f32 %v4296_v9, %v3937_v16  ;;  %v4378_v31 = vmul.f32 %v4298_v10, %v4019_v44 }
 0x313   : > { %3212 = vrot.lane.b32.xlu1 %v3211_v2, %s3743_s23  ;;  %v1328_v59 = vadd.f32 %v1327_v35, %v1299_v28  ;;  %3187 = vrot.lane.b32.xlu2 %v3186_v51, %s3737_s3  ;;  %v3351_v48 = vpack.i.bf16 %v4318_v0, %v4322_v34  ;;  %v3221_v61 = vpack.i.bf16 %v1626_v53, %v4015_v42  ;;  %v1333_v2 = vpop.f32.mrf.mxu0  ;;  %v4364_v28 = vld [vmem:[#allocation2 + $0x30] sm:$0xff] }
 0x314   : > { %v1273_v58 = vadd.f32 %v1272_v56, %v1244_v13  ;;  %v1542_v35 = vmul.f32 %v4296_v9, %v3994_v36  ;;  %v3386_v46 = vpack.i.bf16 %v4352_v4, %v4344_v20 }
 0x315   : > { %vm1340_vm9 = vcmp.ge.f32.partialorder %v1328_v59, 0.0  ;;  %v1349_v56 = vmul.f32 %v4283_v50, %v1328_v59 }
 0x316   : > { %vm1341_vm8 = vcmp.ge.f32.partialorder %v1273_v58, 0.0  ;;  %v1350_v37 = vmul.f32 %v4283_v50, %v1273_v58  ;;  %v3226_v13 = vpack.i.bf16 %v1542_v35, %v4009_v40  ;;  %v4421_v35 = vmul.f32 %v4286_v57, %v3933_v14 }
 0x317   : > { %v4330_v41 = vsel %vm1340_vm9, %v1328_v59, %v1349_v56 }
 0x318   : > { %v4328_v33 = vsel %vm1341_vm8, %v1273_v58, %v1350_v37  ;;  %v1301_v54 = vpop.f32.mrf.mxu3  ;;  %1365 = vst [vmem:[#allocation2 + $0x8] sm:$0xff] %v4330_v41  ;;  %v3236_v51 = vpack.i.bf16 %v4364_v28, %v4330_v41  ;;  %v4370_v58 = vmul.f32 %v4330_v41, %v4019_v44  ;;  %v1627_v37 = vmul.f32 %v4330_v41, %v3960_v24 }
 0x319   : > { %1366 = vst [vmem:[#allocation2 + $0x20] sm:$0xff] %v4328_v33  ;;  %v1246_v30 = vpop.f32.mrf.mxu2  ;;  %v1302_v63 = vadd.f32 %v1301_v54, %v4279_v43  ;;  %v1383_v43 = vmul.f32 %v4286_v57, %v4031_v49  ;;  %v3251_v57 = vpack.i.bf16 %v4328_v33, %v4364_v28  ;;  %v1726_v34 = vmul.f32 %v4330_v41, %v4006_v39 }
 0x31a   : > { %v1247_v62 = vadd.f32 %v1246_v30, %v1206_v5  ;;  %3217 = vrot.lane.b32.xlu0 %v3216_v25, %s3740_s27  ;;  %v3356_v56 = vpack.i.bf16 %v4378_v31, %v4370_v58  ;;  %v4396_v25 = vmul.f32 %v4328_v33, %v3937_v16 }
 0x31b   : > { %3222 = vrot.lane.b32.xlu1 %v3221_v61, %s3737_s3  ;;  %v1331_v7 = vadd.f32 %v1330_v47, %v1302_v63  ;;  %3192 = vrot.lane.b32.xlu2 %v3191_v55, %s3738_s21  ;;  %v3196_v12 = vpack.i.bf16 %v1383_v43, %v4037_v52  ;;  %v1624_v47 = vmul.f32 %v4298_v10, %v3960_v24 }
 0x31c   : > { %v1276_v3 = vadd.f32 %v4281_v60, %v1247_v62  ;;  %v3241_v61 = vpack.i.bf16 %v4298_v10, %v4330_v41  ;;  %v4407_v63 = vmul.f32 %v4296_v9, %v3933_v14  ;;  %v3206_v55 = vpack.i.bf16 %v4296_v9, %v4364_v28 }
 0x31d   : > { %vm1342_vm11 = vcmp.ge.f32.partialorder %v1331_v7, 0.0  ;;  %v1351_v11 = vmul.f32 %v4283_v50, %v1331_v7  ;;  %v3246_v62 = vpack.i.bf16 %v1624_v47, %v1627_v37  ;;  %v1810_v43 = vmul.f32 %v4330_v41, %v3967_v26 }
 0x31e   : > { %vm1343_vm10 = vcmp.ge.f32.partialorder %v1276_v3, 0.0  ;;  %v1352_v60 = vmul.f32 %v4283_v50, %v1276_v3  ;;  %v1389_v47 = vmul.f32 %v4328_v33, %v4031_v49 }
 0x31f   : > { %v4358_v8 = vsel %vm1342_vm11, %v1331_v7, %v1351_v11  ;;  %v4417_v7 = vmul.f32 %v4328_v33, %v3933_v14  ;;  %v3416_v11 = vpack.i.bf16 %v4421_v35, %v4407_v63 }
 0x320   : > { %v4356_v6 = vsel %vm1343_vm10, %v1276_v3, %v1352_v60  ;;  %v1304_v1 = vpop.f32.mrf.mxu3  ;;  %1367 = vst [vmem:[#allocation2 + $0x10] sm:$0xff] %v4358_v8 }
 0x321   : > { %1368 = vst [vmem:[#allocation2 + $0x70] sm:$0xff] %v4356_v6  ;;  %v1305_v59 = vadd.f32 %v1304_v1, %v1206_v5  ;;  %v4390_v30 = vmul.f32 %v4356_v6, %v3937_v16  ;;  %v1386_v1 = vmul.f32 %v4296_v9, %v4031_v49  ;;  %v1543_v9 = vmul.f32 %v4330_v41, %v3985_v32 }
 0x322   : > { %3227 = vrot.lane.b32.xlu0 %v3226_v13, %s3738_s21 }
 0x323   : > { %3237 = vrot.lane.b32.xlu1 %v3236_v51, %s3743_s23  ;;  %v1334_v53 = vadd.f32 %v1333_v2, %v1305_v59  ;;  %3197 = vrot.lane.b32.xlu2 %v3196_v12, %s3736_s0  ;;  %v3381_v3 = vpack.i.bf16 %v4396_v25, %v4390_v30  ;;  %v4434_v2 = vmul.f32 %v4364_v28, %v3941_v18 }
 0x324   : > { %v3231_v51 = vpack.i.bf16 %v1386_v1, %v4037_v52  ;;  %v1545_v18 = vmul.f32 %v4328_v33, %v3994_v36  ;;  %v1540_v59 = vmul.f32 %v4298_v10, %v3985_v32  ;;  %v1632_v1 = vmul.f32 %v4356_v6, %v3999_v38 }
 0x325   : > { %vm1344_vm12 = vcmp.ge.f32.partialorder %v1334_v53, 0.0  ;;  %v1353_v5 = vmul.f32 %v4283_v50, %v1334_v53  ;;  %v4403_v50 = vmul.f32 %v4356_v6, %v3933_v14  ;;  %v3261_v13 = vpack.i.bf16 %v4434_v2, %v1810_v43 }
 0x326   : > { %v3256_v12 = vpack.i.bf16 %v1540_v59, %v1543_v9  ;;  %v3271_v37 = vpack.i.bf16 %v1545_v18, %v4009_v40  ;;  %v1815_v43 = vmul.f32 %v4356_v6, %v3935_v15  ;;  %v3301_v9 = vpack.i.bf16 %v1632_v1, %v4015_v42 }
 0x327   : > { %v4392_v54 = vsel %vm1344_vm12, %v1334_v53, %v1353_v5  ;;  %v3411_v60 = vpack.i.bf16 %v4417_v7, %v4403_v50  ;;  %v3281_v53 = vpack.i.bf16 %v4364_v28, %v4358_v8  ;;  %v1629_v5 = vmul.f32 %v4328_v33, %v3999_v38  ;;  %v2112_v50 = vld [vmem:[%s5066_s8] sm:$0xff] }
 0x328   : > { %1369 = vst [vmem:[#allocation2 + $0x78] sm:$0xff] %v4392_v54  ;;  %v1813_v18 = vmul.f32 %v4358_v8, %v3967_v26  ;;  %v1633_v59 = vmul.f32 %v4392_v54, %v3960_v24  ;;  %v1732_v0 = vmul.f32 %v4392_v54, %v4006_v39 }
 0x32a   : > { %3242 = vrot.lane.b32.xlu0 %v3241_v61, %s3744_s14  ;;  %v3266_v61 = vpack.i.bf16 %v1629_v5, %v4015_v42  ;;  %v3296_v42 = vpack.i.bf16 %v4434_v2, %v1813_v18  ;;  %v1548_v5 = vmul.f32 %v4356_v6, %v3994_v36 }
 0x32b   : > { %3247 = vrot.lane.b32.xlu1 %v3246_v62, %s3737_s3  ;;  %3207 = vrot.lane.b32.xlu2 %v3206_v55, %s3744_s14  ;;  %v3291_v62 = vpack.i.bf16 %v4328_v33, %v4356_v6  ;;  %v3276_v55 = vpack.i.bf16 %v1389_v47, %v4037_v52  ;;  %v1549_v47 = vmul.f32 %v4392_v54, %v3985_v32 }
 0x332   : > { %3252 = vrot.lane.b32.xlu0 %v3251_v57, %s3744_s14  ;;  %v1812_v57 = vmul.f32 %v4328_v33, %v3935_v15  ;;  %v1392_v33 = vmul.f32 %v4356_v6, %v4031_v49 }
 0x333   : > { %3262 = vrot.lane.b32.xlu1 %v3261_v13, %s3740_s27  ;;  %3232 = vrot.lane.b32.xlu2 %v3231_v51, %s3736_s0  ;;  %v3286_v13 = vpack.i.bf16 %v4356_v6, %v4364_v28  ;;  %v1816_v6 = vmul.f32 %v4392_v54, %v3967_v26 }
 0x334   : > { %v3316_v51 = vpack.i.bf16 %v1812_v57, %v1815_v43  ;;  %v3326_v43 = vpack.i.bf16 %v4358_v8, %v4392_v54  ;;  %v1729_v57 = vmul.f32 %v4358_v8, %v4006_v39 }
 0x335   : > { %v3341_v1 = vpack.i.bf16 %v4434_v2, %v1816_v6 }
 0x33a   : > { %3257 = vrot.lane.b32.xlu0 %v3256_v12, %s3738_s21  ;;  %v1630_v12 = vmul.f32 %v4358_v8, %v3960_v24 }
 0x33b   : > { %3282 = vrot.lane.b32.xlu1 %v3281_v53, %s3743_s23  ;;  %3272 = vrot.lane.b32.xlu2 %v3271_v37, %s3738_s21  ;;  %v3311_v37 = vpack.i.bf16 %v1392_v33, %v4037_v52  ;;  %v3321_v52 = vpack.i.bf16 %v4364_v28, %v4392_v54 }
 0x33c   : > { %v3331_v53 = vpack.i.bf16 %v1630_v12, %v1633_v59  ;;  %v4539_v59 = vmul.f32 %v4364_v28, %v3953_v21  ;;  %v1972_v12 = vmul.f32 %v4392_v54, %v3974_v27 }
 0x33e   : > { %v3376_v58 = vpack.i.bf16 %v4539_v59, %v1732_v0  ;;  %v3361_v31 = vpack.i.bf16 %v4539_v59, %v1726_v34  ;;  %v3401_v21 = vpack.i.bf16 %v3944_v19, %v1972_v12 }
 0x342   : > { %3267 = vrot.lane.b32.xlu0 %v3266_v61, %s3737_s3  ;;  %v1546_v61 = vmul.f32 %v4358_v8, %v3985_v32 }
 0x343   : > { %3292 = vrot.lane.b32.xlu1 %v3291_v62, %s3743_s23  ;;  %3277 = vrot.lane.b32.xlu2 %v3276_v55, %s3736_s0  ;;  %v3306_v62 = vpack.i.bf16 %v1548_v5, %v4009_v40 }
 0x344   : > { %v3336_v55 = vpack.i.bf16 %v1546_v61, %v1549_v47 }
 0x34a   : > { %3287 = vrot.lane.b32.xlu0 %v3286_v13, %s3744_s14  ;;  %v1393_v13 = vmul.f32 %v4392_v54, %v4019_v44  ;;  %v1966_v54 = vmul.f32 %v4330_v41, %v3974_v27 }
 0x34b   : > { %3317 = vrot.lane.b32.xlu1 %v3316_v51, %s3740_s27  ;;  %3302 = vrot.lane.b32.xlu2 %v3301_v9, %s3737_s3  ;;  %v1390_v51 = vmul.f32 %v4358_v8, %v4019_v44  ;;  %v3346_v9 = vpack.i.bf16 %v3956_v22, %v1729_v57  ;;  %v1723_v22 = vmul.f32 %v4298_v10, %v4006_v39 }
 0x34c   : > { %v3396_v25 = vpack.i.bf16 %v3944_v19, %v1966_v54 }
 0x34d   : > { %v3366_v18 = vpack.i.bf16 %v1390_v51, %v1393_v13 }
 0x352   : > { %3297 = vrot.lane.b32.xlu0 %v3296_v42, %s3740_s27  ;;  %v1969_v42 = vmul.f32 %v4358_v8, %v3974_v27 }
 0x353   : > { %3332 = vrot.lane.b32.xlu1 %v3331_v53, %s3737_s3  ;;  %3312 = vrot.lane.b32.xlu2 %v3311_v37, %s3736_s0  ;;  %v1963_v37 = vmul.f32 %v4298_v10, %v3974_v27  ;;  %v2113_v10 = vld [vmem:[%s5066_s8 + $0x8] sm:$0xff] }
 0x354   : > { %v3391_v30 = vpack.i.bf16 %v3944_v19, %v1969_v42 }
 0x355   : > { %v3406_v20 = vpack.i.bf16 %v3944_v19, %v1963_v37 }
 0x35a   : > { %3307 = vrot.lane.b32.xlu0 %v3306_v62, %s3738_s21 }
 0x35b   : > { %3337 = vrot.lane.b32.xlu1 %v3336_v55, %s3738_s21  ;;  %3322 = vrot.lane.b32.xlu2 %v3321_v52, %s3743_s23 }
 0x362   : > { %3327 = vrot.lane.b32.xlu0 %v3326_v43, %s3744_s14 }
 0x363   : > { %3342 = vrot.lane.b32.xlu1 %v3341_v1, %s3740_s27  ;;  %3352 = vrot.lane.b32.xlu2 %v3351_v48, %s3740_s27 }
 0x365   : > { %v4514_v40 = vpop.permute.xlu2 %3182 }
 0x36a   : > { %3357 = vrot.lane.b32.xlu0 %v3356_v56, %s3736_s0  ;;  %v3371_v56 = vpack.i.bf16 %v4539_v59, %v1723_v22 }
 0x36b   : > { %3347 = vrot.lane.b32.xlu1 %v3346_v9, %s3739_s24  ;;  %3367 = vrot.lane.b32.xlu2 %v3366_v18, %s3736_s0 }
 0x36d   : > { %v4533_v48 = vpop.permute.xlu2 %3187 }
 0x36e   : > { %v3189_v42 = vunpack.i.l.bf16 %v4533_v48 }
 0x372   : > { %3377 = vrot.lane.b32.xlu0 %v3376_v58, %s3739_s24 }
 0x373   : > { %3362 = vrot.lane.b32.xlu1 %v3361_v31, %s3739_s24  ;;  %3372 = vrot.lane.b32.xlu2 %v3371_v56, %s3739_s24 }
 0x375   : > { %v4547_v33 = vpop.permute.xlu2 %3192 }
 0x37a   : > { %3382 = vrot.lane.b32.xlu0 %v3381_v3, %s3739_s24  ;;  %v2413_v3 = vmul.f32 %v4364_v28, %v3958_v23 }
 0x37b   : > { %3387 = vrot.lane.b32.xlu1 %v3386_v46, %s3739_s24  ;;  %3402 = vrot.lane.b32.xlu2 %v3401_v21, %s3741_s30  ;;  %v3190_v21 = vunpack.i.h.bf16 %v4533_v48 }
 0x37c   : > { %v3421_v7 = vpack.i.bf16 %v2413_v3, %v2413_v3 }
 0x37d   : > { %v4565_v53 = vpop.permute.xlu2 %3197 }
 0x382   : > { %3392 = vrot.lane.b32.xlu0 %v3391_v30, %s3741_s30 }
 0x383   : > { %3397 = vrot.lane.b32.xlu1 %v3396_v25, %s3741_s30  ;;  %3407 = vrot.lane.b32.xlu2 %v3406_v20, %s3741_s30 }
 0x384   : > { %v4575_v4 = vpop.permute.xlu0 %3202 }
 0x385   : > { %v4577_v41 = vpop.permute.xlu1 %3212  ;;  %v4579_v8 = vpop.permute.xlu2 %3207 }
 0x386   : > { %v3214_v48 = vunpack.i.l.bf16 %v4577_v41 }
 0x38a   : > { %3412 = vrot.lane.b32.xlu0 %v3411_v60, %s3741_s30 }
 0x38b   : > { %3417 = vrot.lane.b32.xlu1 %v3416_v11, %s3741_s30  ;;  %2121 = vperm.xlu2 %3059, %v2113_v10   ;;  %v3204_v10 = vunpack.i.l.bf16 %v4575_v4 }
 0x38c   : > { %v4592_v19 = vpop.permute.xlu0 %3217 }
 0x38d   : > { %v4594_v46 = vpop.permute.xlu1 %3222  ;;  %v4598_v5 = vpop.permute.xlu2 %3232 }
 0x38e   : > { %v3225_v51 = vunpack.i.h.bf16 %v4594_v46  ;;  %v3224_v0 = vunpack.i.l.bf16 %v4594_v46  ;;  %v3215_v46 = vunpack.i.h.bf16 %v4577_v41 }
 0x390   : > { %v1672_v20 = vsel %vm588_vm4, %v3224_v0, %v3225_v51  ;;  %v1926_v41 = vsel %vm669_vm6, %v3215_v46, %v3204_v10 }
 0x392   : > { %2116 = vperm.xlu0 %3180, %v2112_v50   ;;  %v1670_v50 = vsel %vm588_vm4, %v3189_v42, %v3190_v21 }
 0x393   : > { %3422 = vrot.lane.b32.xlu1 %v3421_v7, %s3737_s3 }
 0x394   : > { %v4604_v63 = vpop.permute.xlu0 %3227 }
 0x395   : > { %v4606_v35 = vpop.permute.xlu1 %3237  ;;  %v4608_v60 = vpop.permute.xlu2 %3272 }
 0x396   : > { %v3239_v37 = vunpack.i.l.bf16 %v4606_v35  ;;  %v3274_v46 = vunpack.i.l.bf16 %v4608_v60 }
 0x39c   : > { %v4610_v11 = vpop.permute.xlu0 %3242 }
 0x39d   : > { %v4612_v47 = vpop.permute.xlu1 %3247  ;;  %v4614_v23 = vpop.permute.xlu2 %3277 }
 0x39e   : > { %v3250_v42 = vunpack.i.h.bf16 %v4612_v47 }
 0x3a4   : > { %v4616_v61 = vpop.permute.xlu0 %3252 }
 0x3a5   : > { %v4618_v62 = vpop.permute.xlu1 %3262  ;;  %v3303_v55 = vpop.permute.xlu2 %3302 }
 0x3a6   : > { %v3305_v52 = vunpack.i.h.bf16 %v3303_v55  ;;  %v3304_v6 = vunpack.i.l.bf16 %v3303_v55 }
 0x3a8   : > { %v1676_v43 = vsel %vm588_vm4, %v3304_v6, %v3305_v52  ;;  %v1928_v6 = vsel %vm669_vm6, %v3214_v48, %v3239_v37 }
 0x3a9   : > { %2131 = vmatpush.msrb.mxu1 %v1676_v43 }
 0x3ac   : > { %v4621_v1 = vpop.permute.xlu0 %3257 }
 0x3ad   : > { %v4623_v57 = vpop.permute.xlu1 %3282  ;;  %v4625_v13 = vpop.permute.xlu2 %3312 }
 0x3ae   : > { %v3284_v30 = vunpack.i.l.bf16 %v4623_v57 }
 0x3b4   : > { %v3268_v9 = vpop.permute.xlu0 %3267 }
 0x3b5   : > { %v3293_v18 = vpop.permute.xlu1 %3292  ;;  %v3270_v34 = vunpack.i.h.bf16 %v3268_v9  ;;  %v3269_v22 = vunpack.i.l.bf16 %v3268_v9  ;;  %v4629_v31 = vpop.permute.xlu2 %3322 }
 0x3b6   : > { %v3294_v58 = vunpack.i.l.bf16 %v3293_v18  ;;  %v3295_v56 = vunpack.i.h.bf16 %v3293_v18  ;;  %v3324_v12 = vunpack.i.l.bf16 %v4629_v31 }
 0x3b7   : > { %v1674_v54 = vsel %vm588_vm4, %v3269_v22, %v3270_v34 }
 0x3b8   : > { %2132 = vmatpush.msrb.mxu1 %v1674_v54  ;;  %v1932_v25 = vsel %vm669_vm6, %v3294_v58, %v3324_v12  ;;  %v1930_v3 = vsel %vm669_vm6, %v3295_v56, %v3284_v30  ;;  %v3249_v58 = vunpack.i.l.bf16 %v4612_v47 }
 0x3b9   : > { %2154 = vmatpush.msrb.mxu2 %v1932_v25 }
 0x3ba   : > { %2133 = vmatpush.msrb.mxu1 %v1672_v20  ;;  %v1673_v25 = vsel %vm588_vm4, %v3225_v51, %v3249_v58  ;;  %v3275_v20 = vunpack.i.h.bf16 %v4608_v60  ;;  %v3229_v51 = vunpack.i.l.bf16 %v4604_v63  ;;  %v3195_v58 = vunpack.i.h.bf16 %v4547_v33 }
 0x3bb   : > { %2155 = vmatpush.msrb.mxu2 %v1930_v3 }
 0x3bc   : > { %v4648_v7 = vpop.permute.xlu0 %3287  ;;  %2134 = vmatpush.msrb.mxu1 %v1670_v50  ;;  %v1671_v50 = vsel %vm588_vm4, %v3190_v21, %v3250_v42  ;;  %v3194_v21 = vunpack.i.l.bf16 %v4547_v33  ;;  %v1590_v42 = vsel %vm557_vm0, %v3274_v46, %v3275_v20  ;;  %v3255_v33 = vunpack.i.h.bf16 %v4616_v61 }
 0x3bd   : > { %v4650_v55 = vpop.permute.xlu1 %3317  ;;  %2156 = vmatpush.msrb.mxu2 %v1928_v6  ;;  %v4658_v43 = vpop.permute.xlu2 %3352 }
 0x3bf   : > { %2157 = vmatpush.msrb.mxu2 %v1926_v41 }
 0x3c4   : > { %v4660_v9 = vpop.permute.xlu0 %3297 }
 0x3c5   : > { %v3333_v18 = vpop.permute.xlu1 %3332  ;;  %v4670_v6 = vpop.permute.xlu2 %3367 }
 0x3c6   : > { %v3335_v0 = vunpack.i.h.bf16 %v3333_v18  ;;  %v3334_v22 = vunpack.i.l.bf16 %v3333_v18 }
 0x3c8   : > { %v1677_v56 = vsel %vm588_vm4, %v3305_v52, %v3334_v22  ;;  %v1675_v54 = vsel %vm588_vm4, %v3270_v34, %v3335_v0  ;;  %v3230_v34 = vunpack.i.h.bf16 %v4604_v63  ;;  %v3259_v0 = vunpack.i.l.bf16 %v4621_v1 }
 0x3c9   : > { %2200 = vmatpush.msra.mxu3 %v1677_v56  ;;  %v3260_v56 = vunpack.i.h.bf16 %v4621_v1  ;;  %v3290_v63 = vunpack.i.h.bf16 %v4648_v7  ;;  %v3254_v1 = vunpack.i.l.bf16 %v4616_v61  ;;  %v3209_v61 = vunpack.i.l.bf16 %v4579_v8 }
 0x3cb   : > { %2201 = vmatpush.msra.mxu3 %v1675_v54  ;;  %v1587_v46 = vsel %vm557_vm0, %v3195_v58, %v3260_v56 }
 0x3cc   : > { %v3308_v48 = vpop.permute.xlu0 %3307 }
 0x3cd   : > { %v3338_v3 = vpop.permute.xlu1 %3337  ;;  %2202 = vmatpush.msra.mxu3 %v1673_v25  ;;  %v3310_v52 = vunpack.i.h.bf16 %v3308_v48  ;;  %v3309_v41 = vunpack.i.l.bf16 %v3308_v48  ;;  %v3289_v25 = vunpack.i.l.bf16 %v4648_v7  ;;  %v1588_v48 = vsel %vm557_vm0, %v3229_v51, %v3230_v34 }
 0x3ce   : > { %v3340_v47 = vunpack.i.h.bf16 %v3338_v3  ;;  %v3339_v18 = vunpack.i.l.bf16 %v3338_v3  ;;  %v1589_v3 = vsel %vm557_vm0, %v3230_v34, %v3259_v0  ;;  %v3299_v7 = vunpack.i.l.bf16 %v4660_v9 }
 0x3cf   : > { %2203 = vmatpush.msra.mxu3 %v1671_v50  ;;  %v1592_v60 = vsel %vm557_vm0, %v3309_v41, %v3310_v52  ;;  %v3319_v41 = vunpack.i.l.bf16 %v4650_v55  ;;  %v3210_v34 = vunpack.i.h.bf16 %v4579_v8  ;;  %v3320_v51 = vunpack.i.h.bf16 %v4650_v55 }
 0x3d0   : > { %v1593_v22 = vsel %vm557_vm0, %v3310_v52, %v3339_v18  ;;  %2135 = vmatpush.msrb.mxu1 %v1592_v60  ;;  %v1591_v54 = vsel %vm557_vm0, %v3275_v20, %v3340_v47  ;;  %v1586_v20 = vsel %vm557_vm0, %v3194_v21, %v3195_v58  ;;  %v3354_v60 = vunpack.i.l.bf16 %v4658_v43 }
 0x3d1   : > { %2204 = vmatpush.msra.mxu3 %v1593_v22  ;;  %v4699_v22 = vpop.permute.xlu2 %3372  ;;  %v1508_v58 = vsel %vm523_vm7, %v3289_v25, %v3290_v63  ;;  %v3184_v8 = vunpack.i.l.bf16 %v4514_v40  ;;  %v3244_v55 = vunpack.i.l.bf16 %v4610_v11  ;;  %v1506_v25 = vsel %vm523_vm7, %v3254_v1, %v3255_v33 }
 0x3d2   : > { %2136 = vmatpush.msrb.mxu1 %v1590_v42  ;;  %v3185_v42 = vunpack.i.h.bf16 %v4514_v40 }
 0x3d3   : > { %2205 = vmatpush.msra.mxu3 %v1591_v54  ;;  %v3264_v54 = vunpack.i.l.bf16 %v4618_v62 }
 0x3d4   : > { %v3328_v50 = vpop.permute.xlu0 %3327  ;;  %2137 = vmatpush.msrb.mxu1 %v1588_v48  ;;  %v3355_v48 = vunpack.i.h.bf16 %v4658_v43  ;;  %v3314_v43 = vunpack.i.l.bf16 %v4625_v13 }
 0x3d5   : > { %v4688_v52 = vpop.permute.xlu1 %3342  ;;  %2206 = vmatpush.msra.mxu3 %v1589_v3  ;;  %v3329_v47 = vunpack.i.l.bf16 %v3328_v50  ;;  %v3330_v0 = vunpack.i.h.bf16 %v3328_v50  ;;  %v1858_v3 = vsel %vm540_vm2, %v3320_v51, %v3299_v7  ;;  %v1504_v50 = vsel %vm523_vm7, %v3209_v61, %v3210_v34 }
 0x3d6   : > { %v3344_v18 = vunpack.i.l.bf16 %v4688_v52  ;;  %2138 = vmatpush.msrb.mxu1 %v1586_v20  ;;  %v3219_v20 = vunpack.i.l.bf16 %v4592_v19  ;;  %v1856_v1 = vsel %vm540_vm2, %v3354_v60, %v3264_v54  ;;  %v3280_v61 = vunpack.i.h.bf16 %v4614_v23 }
 0x3d7   : > { %2207 = vmatpush.msra.mxu3 %v1587_v46  ;;  %v1509_v56 = vsel %vm523_vm7, %v3290_v63, %v3329_v47  ;;  %v3245_v63 = vunpack.i.h.bf16 %v4610_v11  ;;  %v1507_v40 = vsel %vm523_vm7, %v3255_v33, %v3330_v0  ;;  %v3315_v46 = vunpack.i.h.bf16 %v4625_v13 }
 0x3d8   : > { %v1860_v21 = vsel %vm540_vm2, %v3319_v41, %v3344_v18  ;;  %2139 = vmatpush.msrb.mxu1 %v1508_v58  ;;  %v3369_v41 = vunpack.i.l.bf16 %v4670_v6  ;;  %v1505_v33 = vsel %vm523_vm7, %v3210_v34, %v3244_v55  ;;  %v3279_v51 = vunpack.i.l.bf16 %v4614_v23 }
 0x3d9   : > { %2158 = vmatpush.msrb.mxu2 %v1860_v21  ;;  %2208 = vmatpush.msra.mxu3 %v1509_v56  ;;  %v1502_v13 = vsel %vm523_vm7, %v3184_v8, %v3185_v42  ;;  %v1854_v0 = vsel %vm540_vm2, %v3355_v48, %v3219_v20  ;;  %v3370_v60 = vunpack.i.h.bf16 %v4670_v6  ;;  %v1503_v58 = vsel %vm523_vm7, %v3185_v42, %v3245_v63  ;;  %v4742_v6 = vpop.permute.xlu2 %3402 }
 0x3da   : > { %2140 = vmatpush.msrb.mxu1 %v1506_v25  ;;  %v3235_v21 = vunpack.i.h.bf16 %v4598_v5  ;;  %v3234_v34 = vunpack.i.l.bf16 %v4598_v5  ;;  %v1436_v23 = vsel %vm504_vm1, %v3314_v43, %v3315_v46  ;;  %v1437_v8 = vsel %vm504_vm1, %v3315_v46, %v3369_v41 }
 0x3db   : > { %2159 = vmatpush.msrb.mxu2 %v1858_v3  ;;  %2209 = vmatpush.msra.mxu3 %v1507_v40  ;;  %v3200_v55 = vunpack.i.h.bf16 %v4565_v53  ;;  %v3199_v48 = vunpack.i.l.bf16 %v4565_v53  ;;  %v1434_v42 = vsel %vm504_vm1, %v3279_v51, %v3280_v61  ;;  %v1435_v5 = vsel %vm504_vm1, %v3280_v61, %v3370_v60 }
 0x3dc   : > { %v3358_v11 = vpop.permute.xlu0 %3357  ;;  %2141 = vmatpush.msrb.mxu1 %v1504_v50  ;;  %v3325_v3 = vunpack.i.h.bf16 %v4629_v31  ;;  %v1432_v63 = vsel %vm504_vm1, %v3234_v34, %v3235_v21  ;;  %v3405_v40 = vunpack.i.h.bf16 %v4742_v6  ;;  %v3404_v50 = vunpack.i.l.bf16 %v4742_v6  ;;  %v2037_v34 = vld [vmem:[%s5065_s7 + $0x18] sm:$0xff]  ;;  %v2038_v6 = vld [vmem:[%s5065_s7 + $0x20] sm:$0xff] }
 0x3dd   : > { %v4725_v47 = vpop.permute.xlu1 %3347  ;;  %2160 = vmatpush.msrb.mxu2 %v1856_v1  ;;  %2210 = vmatpush.msra.mxu3 %v1505_v33  ;;  %v3359_v56 = vunpack.i.l.bf16 %v3358_v11  ;;  %v3360_v25 = vunpack.i.h.bf16 %v3358_v11  ;;  %v2034_v1 = vld [vmem:[%s5065_s7] sm:$0xff]  ;;  %v3285_v41 = vunpack.i.h.bf16 %v4623_v57  ;;  %v1430_v11 = vsel %vm504_vm1, %v3199_v48, %v3200_v55 }
 0x3de   : > { %2142 = vmatpush.msrb.mxu1 %v1502_v13  ;;  %v3240_v61 = vunpack.i.h.bf16 %v4606_v35  ;;  %v1933_v51 = vsel %vm669_vm6, %v3324_v12, %v3325_v3  ;;  %v4768_v13 = vsel %vm487_vm5, %v3404_v50, %v3405_v40  ;;  %v3345_v31 = vunpack.i.h.bf16 %v4688_v52 }
 0x3df   : > { %2161 = vmatpush.msrb.mxu2 %v1854_v0  ;;  %2211 = vmatpush.msra.mxu3 %v1503_v58  ;;  %v1433_v43 = vsel %vm504_vm1, %v3235_v21, %v3359_v56  ;;  %v1431_v33 = vsel %vm504_vm1, %v3200_v55, %v3360_v25  ;;  %v3205_v0 = vunpack.i.h.bf16 %v4575_v4  ;;  %v1931_v60 = vsel %vm669_vm6, %v3284_v30, %v3285_v41 }
 0x3e0   : > { %2143 = vmatpush.msrb.mxu1 %v1436_v23  ;;  %v1929_v12 = vsel %vm669_vm6, %v3239_v37, %v3240_v61  ;;  %v3300_v23 = vunpack.i.h.bf16 %v4660_v9  ;;  %v3265_v35 = vunpack.i.h.bf16 %v4618_v62  ;;  %v1861_v37 = vsel %vm540_vm2, %v3344_v18, %v3345_v31 }
 0x3e1   : > { %2212 = vmatpush.msra.mxu3 %v1437_v8  ;;  %v1927_v30 = vsel %vm669_vm6, %v3204_v10, %v3205_v0  ;;  %v3220_v48 = vunpack.i.h.bf16 %v4592_v19  ;;  %v4799_v18 = vpop.permute.xlu2 %3407  ;;  %v3374_v40 = vunpack.i.l.bf16 %v4699_v22  ;;  %v3350_v9 = vunpack.i.h.bf16 %v4725_v47 }
 0x3e2   : > { %2144 = vmatpush.msrb.mxu1 %v1434_v42  ;;  %v3349_v42 = vunpack.i.l.bf16 %v4725_v47  ;;  %v1859_v4 = vsel %vm540_vm2, %v3299_v7, %v3300_v23  ;;  %v3410_v62 = vunpack.i.h.bf16 %v4799_v18  ;;  %v3409_v47 = vunpack.i.l.bf16 %v4799_v18  ;;  %v1695_v18 = vld [vmem:[#allocation2 + $0x58] sm:$0xff] }
 0x3e3   : > { %2213 = vmatpush.msra.mxu3 %v1435_v5  ;;  %v1855_v41 = vsel %vm540_vm2, %v3219_v20, %v3220_v48  ;;  %v1700_v20 = vld [vmem:[#allocation2 + $0x70] sm:$0xff] }
 0x3e4   : > { %v4750_v46 = vpop.permute.xlu0 %3377  ;;  %2145 = vmatpush.msrb.mxu1 %v1432_v63  ;;  %v1857_v63 = vsel %vm540_vm2, %v3264_v54, %v3265_v35  ;;  %v1775_v31 = vsel %vm571_vm3, %v3349_v42, %v3350_v9 }
 0x3e5   : > { %v4752_v53 = vpop.permute.xlu1 %3362  ;;  %2214 = vmatpush.msra.mxu3 %v1433_v43  ;;  %v3379_v57 = vunpack.i.l.bf16 %v4750_v46  ;;  %v3380_v3 = vunpack.i.h.bf16 %v4750_v46 }
 0x3e6   : > { %2146 = vmatpush.msrb.mxu1 %v1430_v11  ;;  %v3364_v10 = vunpack.i.l.bf16 %v4752_v53 }
 0x3e7   : > { %2215 = vmatpush.msra.mxu3 %v1431_v33  ;;  %2147 = vmatmul.f32.vlgmr.msrb.gmra.mxu1 %v2034_v1  ;;  %v1777_v0 = vsel %vm571_vm3, %v3379_v57, %v3380_v3  ;;  %v2036_v3 = vld [vmem:[%s5065_s7 + $0x10] sm:$0xff] }
 0x3e8   : > { %2216 = vmatmul.f32.vlgmr.msra.gmra.mxu3 %v2034_v1  ;;  %2223 = vmatpush.msra.mxu1 %v1933_v51  ;;  %v3365_v51 = vunpack.i.h.bf16 %v4752_v53  ;;  %v2039_v53 = vld [vmem:[%s5065_s7 + $0x28] sm:$0xff] }
 0x3e9   : > { %2920 = vmatpush.msrb.mxu3 %v4768_v13 }
 0x3ea   : > { %2224 = vmatpush.msra.mxu1 %v1931_v60  ;;  %v3375_v60 = vunpack.i.h.bf16 %v4699_v22  ;;  %v1696_v22 = vld [vmem:[#allocation2 + $0x68] sm:$0xff] }
 0x3ec   : > { %2225 = vmatpush.msra.mxu1 %v1929_v12  ;;  %v3383_v58 = vpop.permute.xlu0 %3382 }
 0x3ed   : > { %v3388_v21 = vpop.permute.xlu1 %3387  ;;  %v3384_v56 = vunpack.i.l.bf16 %v3383_v58  ;;  %v3385_v8 = vunpack.i.h.bf16 %v3383_v58  ;;  %v1698_v58 = vld [vmem:[#allocation2 + $0x20] sm:$0xff] }
 0x3ee   : > { %2226 = vmatpush.msra.mxu1 %v1927_v30  ;;  %v3389_v25 = vunpack.i.l.bf16 %v3388_v21  ;;  %v3390_v5 = vunpack.i.h.bf16 %v3388_v21  ;;  %v1773_v21 = vsel %vm571_vm3, %v3364_v10, %v3365_v51  ;;  %v1771_v30 = vsel %vm571_vm3, %v3374_v40, %v3375_v60 }
 0x3ef   : > { %2150 = vmatmul.f32.gmra.mxu1 %v2037_v34  ;;  %v1776_v55 = vsel %vm571_vm3, %v3384_v56, %v3379_v57  ;;  %v1774_v52 = vsel %vm571_vm3, %v3385_v8, %v3349_v42  ;;  %v2035_v8 = vld [vmem:[%s5065_s7 + $0x8] sm:$0xff] }
 0x3f0   : > { %2219 = vmatmul.f32.gmra.mxu3 %v2037_v34  ;;  %2227 = vmatpush.msra.mxu1 %v1861_v37  ;;  %v1772_v1 = vsel %vm571_vm3, %v3389_v25, %v3364_v10  ;;  %v1770_v54 = vsel %vm571_vm3, %v3390_v5, %v3374_v40  ;;  %v2011_v34 = vsel %vm487_vm5, %v3409_v47, %v3410_v62  ;;  %v1694_v37 = vld [vmem:[#allocation2] sm:$0xff]  ;;  %v1699_v25 = vld [vmem:[#allocation2 + $0x10] sm:$0xff]  ;;  %v1697_v5 = vld [vmem:[#allocation2 + $0x8] sm:$0xff]  ;;  %v2122_v62 = vpop.permute.xlu2 %2121 }
 0x3f1   : > { %2162 = vmatpush.msrb.mxu2 %v1776_v55  ;;  %v1701_v55 = vld [vmem:[#allocation2 + $0x78] sm:$0xff] }
 0x3f2   : > { %2228 = vmatpush.msra.mxu1 %v1859_v4 }
 0x3f3   : > { %2163 = vmatpush.msrb.mxu2 %v1774_v52 }
 0x3f4   : > { %2229 = vmatpush.msra.mxu1 %v1857_v63  ;;  %v3393_v7 = vpop.permute.xlu0 %3392 }
 0x3f5   : > { %v3398_v43 = vpop.permute.xlu1 %3397  ;;  %v3395_v11 = vunpack.i.h.bf16 %v3393_v7  ;;  %v3394_v46 = vunpack.i.l.bf16 %v3393_v7  ;;  %2164 = vmatpush.msrb.mxu2 %v1772_v1 }
 0x3f6   : > { %v3400_v33 = vunpack.i.h.bf16 %v3398_v43  ;;  %v3399_v61 = vunpack.i.l.bf16 %v3398_v43  ;;  %2230 = vmatpush.msra.mxu1 %v1855_v41 }
 0x3f7   : > { %2165 = vmatpush.msrb.mxu2 %v1770_v54  ;;  %v2015_v19 = vsel %vm487_vm5, %v3394_v46, %v3395_v11 }
 0x3f8   : > { %2231 = vmatpush.msra.mxu1 %v1777_v0  ;;  %2921 = vmatpush.msrb.mxu3 %v2015_v19  ;;  %v2013_v12 = vsel %vm487_vm5, %v3399_v61, %v3400_v33  ;;  %v2274_v33 = vstv %s2912_s15  ;;  %s3672_s15 = scalar_lea.hbm %s5069_s11, 4 }
 0x3f9   : > { %2166 = vmatpush.msrb.mxu2 %v1700_v20 }
 0x3fa   : > { %2232 = vmatpush.msra.mxu1 %v1775_v31  ;;  %2922 = vmatpush.msrb.mxu3 %v2013_v12 }
 0x3fb   : > { %2167 = vmatpush.msrb.mxu2 %v1698_v58 }
 0x3fc   : > { %2233 = vmatpush.msra.mxu1 %v1773_v21  ;;  %v3413_v23 = vpop.permute.xlu0 %3412  ;;  %2923 = vmatpush.msrb.mxu3 %v2011_v34 }
 0x3fd   : > { %v3414_v57 = vunpack.i.l.bf16 %v3413_v23  ;;  %v3418_v56 = vpop.permute.xlu1 %3417  ;;  %2168 = vmatpush.msrb.mxu2 %v1696_v22  ;;  %2911 = vmatmul.msk.f32.vlgmr.msrb.gmra.mxu3 %vm2124_vm13, %v2039_v53  ;;  %v3415_v35 = vunpack.i.h.bf16 %v3413_v23 }
 0x3fe   : > { %2234 = vmatpush.msra.mxu1 %v1771_v30  ;;  %v3419_v42 = vunpack.i.l.bf16 %v3418_v56  ;;  %v3420_v4 = vunpack.i.h.bf16 %v3418_v56 }
 0x3ff   : > { %2169 = vmatpush.msrb.mxu2 %v1694_v37  ;;  %v2016_v48 = vsel %vm487_vm5, %v3414_v57, %v3404_v50  ;;  %v2014_v10 = vsel %vm487_vm5, %v3415_v35, %v3394_v46 }
 0x400   : > { %2170 = vmatmul.f32.vlgmr.msrb.gmra.mxu2 %v2035_v8  ;;  %2235 = vmatpush.msra.mxu1 %v1701_v55  ;;  %v2012_v52 = vsel %vm487_vm5, %v3419_v42, %v3399_v61  ;;  %v2010_v50 = vsel %vm487_vm5, %v3420_v4, %v3409_v47 }
 0x401   : > { %2189 = vmatpush.msra.mxu0 %v2016_v48 }
 0x402   : > { %2236 = vmatpush.msra.mxu1 %v1699_v25 }
 0x403   : > { %2190 = vmatpush.msra.mxu0 %v2014_v10 }
 0x404   : > { %2237 = vmatpush.msra.mxu1 %v1697_v5  ;;  %v2117_v7 = vpop.permute.xlu0 %2116 }
 0x405   : > { %2191 = vmatpush.msra.mxu0 %v2012_v52 }
 0x406   : > { %2238 = vmatpush.msra.mxu1 %v1695_v18 }
 0x407   : > { %2192 = vmatpush.msra.mxu0 %v2010_v50  ;;  %2239 = vmatmul.f32.vlgmr.msra.gmra.mxu1 %v2035_v8 }
 0x408   : > { %2258 = vmatpush.msrb.mxu1 %v4768_v13  ;;  %2173 = vmatmul.f32.gmra.mxu2 %v2038_v6 }
 0x409   : > { %2908 = vmatmul.msk.f32.vlgmr.msra.gmra.mxu0 %vm2124_vm13, %v2036_v3 }
 0x40a   : > { %2259 = vmatpush.msrb.mxu1 %v2015_v19 }
 0x40c   : > { %2260 = vmatpush.msrb.mxu1 %v2013_v12 }
 0x40e   : > { %2261 = vmatpush.msrb.mxu1 %v2011_v34 }
 0x40f   : > { %2242 = vmatmul.f32.gmra.mxu1 %v2038_v6 }
 0x411   : > { %2909 = vmatmul.msk.f32.gmra.mxu0 %vm2124_vm13, %v2039_v53 }
 0x417   : > { %2910 = vmatmul.msk.f32.vlgmr.msrb.gmra.mxu1 %vm2124_vm13, %v2036_v3 }
 0x464   : > { %v2148_v63 = vpop.f32.mrf.mxu1 }
 0x465   : > { %v2149_v43 = vadd.f32 %v2148_v63, %v2117_v7 }
 0x46b   : > { %v2217_v40 = vpop.f32.mrf.mxu3 }
 0x46c   : > { %v2151_v9 = vpop.f32.mrf.mxu1  ;;  %v2218_v34 = vadd.f32 %v2217_v40, %v2117_v7 }
 0x46d   : > { %v2152_v47 = vadd.f32 %v2151_v9, %v2122_v62 }
 0x473   : > { %v2220_v41 = vpop.f32.mrf.mxu3 }
 0x474   : > { %v2221_v51 = vadd.f32 %v2220_v41, %v2122_v62 }
 0x480   : > { %v2266_v31 = vpop.f32.mrf.mxu3 }
 0x483   : > { %v2171_v1 = vpop.f32.mrf.mxu2 }
 0x484   : > { %v2172_v13 = vadd.f32 %v2171_v1, %v2149_v43  ;;  %v2240_v11 = vpop.f32.mrf.mxu1 }
 0x485   : > { %v2241_v57 = vadd.f32 %v2240_v11, %v2218_v34 }
 0x486   : > { %v2194_v46 = vpop.f32.mrf.mxu0 }
 0x487   : > { %v2195_v61 = vadd.f32 %v2194_v46, %v2172_v13  ;;  %v3546_v13 = vld [vmem:[#allocation2 + $0x30] sm:$0xff] }
 0x489   : > { %vm2270_vm14 = vcmp.ge.f32.partialorder %v2195_v61, 0.0  ;;  %v2275_v54 = vmul.f32 %v2274_v33, %v2195_v61 }
 0x48b   : > { %v4846_v0 = vsel %vm2270_vm14, %v2195_v61, %v2275_v54  ;;  %v2174_v19 = vpop.f32.mrf.mxu2 }
 0x48c   : > { %2283 = vst [vmem:[#allocation2] sm:$0xff] %v4846_v0  ;;  %v2175_v20 = vadd.f32 %v2174_v19, %v2152_v47  ;;  %v2243_v60 = vpop.f32.mrf.mxu1  ;;  %v2505_v8 = vmul.f32 %v4846_v0, %v3935_v15  ;;  %v2463_v48 = vmul.f32 %v4846_v0, %v3937_v16 }
 0x48d   : > { %v2244_v12 = vadd.f32 %v2243_v60, %v2221_v51  ;;  %v2372_v60 = vmul.f32 %v4846_v0, %v3994_v36 }
 0x48e   : > { %v2197_v58 = vpop.f32.mrf.mxu0 }
 0x48f   : > { %v2198_v53 = vadd.f32 %v2197_v58, %v2175_v20  ;;  %v2267_v21 = vadd.f32 %v2266_v31, %v2244_v12  ;;  %v2414_v20 = vmul.f32 %v4846_v0, %v3999_v38  ;;  %v2585_v58 = vmul.f32 %v3546_v13, %v3939_v17 }
 0x491   : > { %vm2272_vm15 = vcmp.ge.f32.partialorder %v2198_v53, 0.0  ;;  %v2277_v23 = vmul.f32 %v2274_v33, %v2198_v53  ;;  %vm2273_vm8 = vcmp.ge.f32.partialorder %v2267_v21, 0.0  ;;  %v2278_v22 = vmul.f32 %v2274_v33, %v2267_v21 }
 0x492   : > { %v3516_v34 = vpack.i.bf16 %v2585_v58, %v2585_v58 }
 0x493   : > { %v4849_v56 = vsel %vm2272_vm15, %v2198_v53, %v2277_v23  ;;  %v4851_v30 = vsel %vm2273_vm8, %v2267_v21, %v2278_v22  ;;  %v2583_v53 = vmul.f32 %v4846_v0, %v3933_v14  ;;  %v3531_v23 = vpack.i.bf16 %v3546_v13, %v3546_v13  ;;  %v2656_v22 = vld [vmem:[#allocation4] sm:$0x1] }
 0x494   : > { %2285 = vst [vmem:[#allocation2 + $0x68] sm:$0xff] %v4849_v56  ;;  %v2263_v35 = vpop.f32.mrf.mxu1  ;;  %v3426_v37 = vpack.i.bf16 %v4846_v0, %v4849_v56  ;;  %v2508_v55 = vmul.f32 %v4849_v56, %v3935_v15  ;;  %v2466_v42 = vmul.f32 %v4849_v56, %v3937_v16  ;;  %v2467_v16 = vmul.f32 %v4851_v30, %v4006_v39 }
 0x495   : > { %2286 = vst [vmem:[#allocation2 + $0x8] sm:$0xff] %v4851_v30  ;;  %v2264_v25 = vadd.f32 %v2263_v35, %v2241_v57  ;;  %v3446_v52 = vpack.i.bf16 %v4851_v30, %v4849_v56  ;;  %v3441_v6 = vpack.i.bf16 %v4364_v28, %v4851_v30  ;;  %v2509_v50 = vmul.f32 %v4851_v30, %v3967_v26 }
 0x496   : > { %3427 = vrot.lane.b32.xlu0 %v3426_v37, %s3743_s23  ;;  %v3431_v4 = vpack.i.bf16 %v2505_v8, %v2508_v55  ;;  %v3436_v10 = vpack.i.bf16 %v2463_v48, %v2466_v42  ;;  %v3456_v18 = vpack.i.bf16 %v4539_v59, %v2467_v16  ;;  %v2586_v3 = vmul.f32 %v4849_v56, %v3933_v14 }
 0x497   : > { %vm2271_vm9 = vcmp.ge.f32.partialorder %v2264_v25, 0.0  ;;  %v2276_v5 = vmul.f32 %v2274_v33, %v2264_v25  ;;  %v2587_v63 = vmul.f32 %v4851_v30, %v3974_v27  ;;  %v3451_v9 = vpack.i.bf16 %v4434_v2, %v2509_v50 }
 0x498   : > { %3432 = vrot.lane.b32.xlu2 %v3431_v4, %s3740_s27  ;;  %3437 = vrot.lane.b32.xlu1 %v3436_v10, %s3739_s24  ;;  %v2417_v43 = vmul.f32 %v4849_v56, %v3999_v38  ;;  %v2418_v1 = vmul.f32 %v4851_v30, %v3960_v24  ;;  %v2375_v46 = vmul.f32 %v4849_v56, %v3994_v36 }
 0x499   : > { %v4868_v15 = vsel %vm2271_vm9, %v2264_v25, %v2276_v5  ;;  %v3471_v28 = vpack.i.bf16 %v2587_v63, %v2586_v3  ;;  %v2376_v33 = vmul.f32 %v4851_v30, %v3985_v32  ;;  %v2297_v61 = vmul.f32 %v4849_v56, %v4031_v49 }
 0x49a   : > { %2284 = vst [vmem:[#allocation2 + $0x58] sm:$0xff] %v4868_v15  ;;  %v2506_v40 = vmul.f32 %v4868_v15, %v3967_v26  ;;  %v2464_v26 = vmul.f32 %v4868_v15, %v4006_v39  ;;  %v3461_v41 = vpack.i.bf16 %v2418_v1, %v2417_v43  ;;  %v3476_v11 = vpack.i.bf16 %v3546_v13, %v4868_v15 }
 0x49b   : > { %v2371_v39 = vmul.f32 %v3546_v13, %v3979_v29  ;;  %v2298_v62 = vmul.f32 %v4851_v30, %v4019_v44  ;;  %v3466_v54 = vpack.i.bf16 %v2376_v33, %v2375_v46  ;;  %v2415_v51 = vmul.f32 %v4868_v15, %v3960_v24 }
 0x49c   : > { %v3486_v7 = vpack.i.bf16 %v4434_v2, %v2506_v40  ;;  %v3491_v2 = vpack.i.bf16 %v4539_v59, %v2464_v26  ;;  %v2373_v29 = vmul.f32 %v4868_v15, %v3985_v32  ;;  %v3481_v19 = vpack.i.bf16 %v4868_v15, %v4846_v0 }
 0x49d   : > { %v3501_v59 = vpack.i.bf16 %v2371_v39, %v2371_v39  ;;  %v3496_v47 = vpack.i.bf16 %v2298_v62, %v2297_v61  ;;  %v3506_v31 = vpack.i.bf16 %v2415_v51, %v2414_v20  ;;  %v2295_v24 = vmul.f32 %v4868_v15, %v4019_v44 }
 0x49e   : > { %3447 = vrot.lane.b32.xlu0 %v3446_v52, %s3744_s14  ;;  %v3511_v12 = vpack.i.bf16 %v2373_v29, %v2372_v60  ;;  %v2294_v32 = vmul.f32 %v4846_v0, %v4031_v49  ;;  %v2584_v38 = vmul.f32 %v4868_v15, %v3974_v27  ;;  %v2293_v44 = vmul.f32 %v3546_v13, %v4021_v45  ;;  %v4945_v27 = vpop.permute.xlu1 %3422 }
 0x4a0   : > { %3457 = vrot.lane.b32.xlu2 %v3456_v18, %s3739_s24  ;;  %3442 = vrot.lane.b32.xlu1 %v3441_v6, %s3743_s23  ;;  %v3526_v36 = vpack.i.bf16 %v2295_v24, %v2294_v32  ;;  %v3521_v21 = vpack.i.bf16 %v2584_v38, %v2583_v53  ;;  %v3536_v49 = vpack.i.bf16 %v2293_v44, %v2293_v44 }
 0x4a6   : > { %3452 = vrot.lane.b32.xlu0 %v3451_v9, %s3740_s27 }
 0x4a8   : > { %3472 = vrot.lane.b32.xlu2 %v3471_v28, %s3741_s30  ;;  %3487 = vrot.lane.b32.xlu1 %v3486_v7, %s3740_s27  ;;  %s2916_s27 = sshll.u32 %s3830_s10, 1 }
 0x4ae   : > { %3462 = vrot.lane.b32.xlu0 %v3461_v41, %s3737_s3 }
 0x4b0   : > { %3477 = vrot.lane.b32.xlu2 %v3476_v11, %s3743_s23  ;;  %3492 = vrot.lane.b32.xlu1 %v3491_v2, %s3739_s24 }
 0x4b6   : > { %3467 = vrot.lane.b32.xlu0 %v3466_v54, %s3738_s21 }
 0x4b8   : > { %3502 = vrot.lane.b32.xlu2 %v3501_v59, %s3738_s21  ;;  %3497 = vrot.lane.b32.xlu1 %v3496_v47, %s3736_s0  ;;  %v4969_v59 = vld [vmem:[%s5067_s9] sm:$0x3] }
 0x4be   : > { %3482 = vrot.lane.b32.xlu0 %v3481_v19, %s3744_s14 }
 0x4c0   : > { %3507 = vrot.lane.b32.xlu2 %v3506_v31, %s3737_s3  ;;  %3512 = vrot.lane.b32.xlu1 %v3511_v12, %s3738_s21  ;;  %v2665_v31 = vperm.slane %v4969_v59, 1  ;;  %s441_s21 = sand.u32 1, %s3718_s20  }
 0x4c1   : > { %s2892_s24 = sshll.u32 %s441_s21, 1  ;;  %s2763_s10 = scalar_lea.sflag [#allocation7], %s441_s21 }
 0x4c2   : > { %s443_s18 = scalar_lea.vmem [#allocation13], %s2892_s24 }
 0x4c3   : > { %s2775_s16 = sshll.u32 %s443_s18, 4  ;;  %s2776_s16 = int_to_ptr.vmem [resolvable:$true] %s2775_s16 }
 0x4c6   : > { %3527 = vrot.lane.b32.xlu0 %v3526_v36, %s3736_s0 }
 0x4c8   : > { %3522 = vrot.lane.b32.xlu2 %v3521_v21, %s3741_s30  ;;  %3517 = vrot.lane.b32.xlu1 %v3516_v34, %s3741_s30 }
 0x4ce   : > { %3537 = vrot.lane.b32.xlu0 %v3536_v49, %s3736_s0  ;;  %v3424_v49 = vunpack.i.l.bf16 %v4945_v27 }
 0x4d0   : > { %3532 = vrot.lane.b32.xlu2 %v3531_v23, %s3744_s14  ;;  %2659 = vperm.xlu1 %3058, %v2656_v22   ;;  %s2773_s14 = scalar_lea.hbm %s5069_s11, %s2916_s27 }
 0x4d1   : > { %s2777_s26 = sshll.u32 %s2773_s14, 4  ;;  %s2778_s26 = int_to_ptr.hbm [resolvable:$true] %s2777_s26 }
 0x4d2   : > { %s3666_s25 = sshra.s32 %s2778_s26, 4  ;;  %s3667_s25 = int_to_ptr.hbm [resolvable:$true] %s3666_s25 }
 0x4d3   : > { %s3668_s17 = scalar_lea.hbm %s3667_s25, 2  ;;  %p3673_p3 = scmp.lt.s32.totalorder %s3667_s25, %s5069_s11 }
 0x4d4   : > { %p3669_p0 = scmp.ne.s32.totalorder %s3667_s25, %s3668_s17  ;;  %p3674_p4 = scmp.lt.s32.totalorder %s3672_s15, %s3668_s17 }
 0x4d6   : > { %p3670_p1 = pnand %p3669_p0, %p3847_p5  ;;  %p3675_p7 = por %p3674_p4, %p3673_p3 }
 0x4d8   : > { %p3671_p2 = pneg %p3670_p1 }
 0x4da   : > { %p3676_p8 = pnand %p3675_p7, %p3671_p2 }
 0x4f2   : > { %v3433_v17 = vpop.permute.xlu2 %3432 }
 0x4f3   : > { %v3434_v43 = vunpack.i.l.bf16 %v3433_v17  ;;  %v3435_v41 = vunpack.i.h.bf16 %v3433_v17 }
 0x4fa   : > { %v3458_v14 = vpop.permute.xlu2 %3457 }
 0x4fb   : > { %v3460_v13 = vunpack.i.h.bf16 %v3458_v14  ;;  %v3459_v46 = vunpack.i.l.bf16 %v3458_v14  ;;  %v3425_v14 = vunpack.i.h.bf16 %v4945_v27 }
 0x4fd   : > { %v2490_v29 = vsel %vm571_vm3, %v3459_v46, %v3460_v13 }
 0x502   : > { %v4947_v57 = vpop.permute.xlu2 %3472 }
 0x503   : > { %v3475_v8 = vunpack.i.h.bf16 %v4947_v57  ;;  %v3474_v35 = vunpack.i.l.bf16 %v4947_v57 }
 0x505   : > { %v2609_v45 = vsel %vm487_vm5, %v3474_v35, %v3475_v8 }
 0x506   : > { %2703 = vmatpush.msra.mxu3 %v2609_v45 }
 0x508   : > { %v3428_v37 = vpop.permute.xlu0 %3427 }
 0x509   : > { %v3429_v25 = vunpack.i.l.bf16 %v3428_v37  ;;  %v3430_v6 = vunpack.i.h.bf16 %v3428_v37 }
 0x50a   : > { %v3478_v55 = vpop.permute.xlu2 %3477  ;;  %v3438_v48 = vpop.permute.xlu1 %3437 }
 0x50b   : > { %v3480_v5 = vunpack.i.h.bf16 %v3478_v55  ;;  %v3479_v16 = vunpack.i.l.bf16 %v3478_v55  ;;  %v3439_v33 = vunpack.i.l.bf16 %v3438_v48  ;;  %v3440_v19 = vunpack.i.h.bf16 %v3438_v48 }
 0x50d   : > { %v2565_v63 = vsel %vm669_vm6, %v3430_v6, %v3479_v16  ;;  %v2566_v40 = vsel %vm669_vm6, %v3479_v16, %v3480_v5  ;;  %v2489_v51 = vsel %vm571_vm3, %v3439_v33, %v3459_v46 }
 0x510   : > { %v4954_v42 = vpop.permute.xlu0 %3447 }
 0x511   : > { %v3449_v5 = vunpack.i.l.bf16 %v4954_v42 }
 0x512   : > { %v4956_v4 = vpop.permute.xlu2 %3502  ;;  %v3443_v10 = vpop.permute.xlu1 %3442 }
 0x513   : > { %v3445_v52 = vunpack.i.h.bf16 %v3443_v10  ;;  %v3444_v18 = vunpack.i.l.bf16 %v3443_v10  ;;  %v3504_v55 = vunpack.i.l.bf16 %v4956_v4  ;;  %v3450_v10 = vunpack.i.h.bf16 %v4954_v42 }
 0x515   : > { %v2567_v50 = vsel %vm669_vm6, %v3429_v25, %v3444_v18  ;;  %v2568_v3 = vsel %vm669_vm6, %v3444_v18, %v3445_v52  ;;  %v3505_v52 = vunpack.i.h.bf16 %v4956_v4  ;;  %v2356_v4 = vsel %vm523_vm7, %v3449_v5, %v3450_v10 }
 0x516   : > { %2669 = vmatpush.msrb.mxu0 %v2567_v50  ;;  %2709 = vmatpush.msra.mxu2 %v2568_v3 }
 0x518   : > { %v3453_v9 = vpop.permute.xlu0 %3452  ;;  %2670 = vmatpush.msrb.mxu0 %v2565_v63  ;;  %2710 = vmatpush.msra.mxu2 %v2566_v40 }
 0x519   : > { %v3455_v28 = vunpack.i.h.bf16 %v3453_v9  ;;  %v3454_v7 = vunpack.i.l.bf16 %v3453_v9 }
 0x51a   : > { %v3488_v1 = vpop.permute.xlu1 %3487  ;;  %v3508_v26 = vpop.permute.xlu2 %3507 }
 0x51b   : > { %v3490_v11 = vunpack.i.h.bf16 %v3488_v1  ;;  %v3489_v2 = vunpack.i.l.bf16 %v3488_v1  ;;  %v2531_v39 = vsel %vm540_vm2, %v3434_v43, %v3454_v7  ;;  %v2532_v61 = vsel %vm540_vm2, %v3454_v7, %v3455_v28 }
 0x51c   : > { %2671 = vmatpush.msrb.mxu0 %v2531_v39  ;;  %2711 = vmatpush.msra.mxu2 %v2532_v61  ;;  %v3509_v23 = vunpack.i.l.bf16 %v3508_v26  ;;  %v3510_v22 = vunpack.i.h.bf16 %v3508_v26  ;;  %v2664_v61 = vperm.slane %v4969_v59, 0 }
 0x51d   : > { %v2529_v62 = vsel %vm540_vm2, %v3435_v41, %v3489_v2  ;;  %v2530_v54 = vsel %vm540_vm2, %v3489_v2, %v3490_v11 }
 0x51e   : > { %2672 = vmatpush.msrb.mxu0 %v2529_v62  ;;  %2712 = vmatpush.msra.mxu2 %v2530_v54  ;;  %v2438_v48 = vsel %vm588_vm4, %v3509_v23, %v3510_v22 }
 0x520   : > { %v3463_v47 = vpop.permute.xlu0 %3462  ;;  %2673 = vmatpush.msrb.mxu0 %v2489_v51  ;;  %2713 = vmatpush.msra.mxu2 %v2490_v29 }
 0x521   : > { %v3464_v21 = vunpack.i.l.bf16 %v3463_v47  ;;  %v3465_v34 = vunpack.i.h.bf16 %v3463_v47 }
 0x522   : > { %v3493_v20 = vpop.permute.xlu1 %3492  ;;  %v4973_v60 = vpop.permute.xlu2 %3522 }
 0x523   : > { %v3495_v12 = vunpack.i.h.bf16 %v3493_v20  ;;  %v3494_v24 = vunpack.i.l.bf16 %v3493_v20  ;;  %v3525_v32 = vunpack.i.h.bf16 %v4973_v60  ;;  %v3524_v38 = vunpack.i.l.bf16 %v4973_v60 }
 0x524   : > { %v2439_v45 = vsel %vm588_vm4, %v3424_v49, %v3464_v21 }
 0x525   : > { %v2487_v58 = vsel %vm571_vm3, %v3440_v19, %v3494_v24  ;;  %v2607_v36 = vsel %vm487_vm5, %v3524_v38, %v3525_v32  ;;  %v2488_v53 = vsel %vm571_vm3, %v3494_v24, %v3495_v12 }
 0x526   : > { %2674 = vmatpush.msrb.mxu0 %v2487_v58  ;;  %2704 = vmatpush.msra.mxu3 %v2607_v36 }
 0x527   : > { %2714 = vmatpush.msra.mxu2 %v2488_v53  ;;  %2913 = vmatmul.msk.f32.vlgmr.msra.gmra.mxu3 %vm523_vm7, %v2665_v31  ;;  %v2757_v53 = vlaneseq }
 0x528   : > { %v3468_v44 = vpop.permute.xlu0 %3467  ;;  %2675 = vmatpush.msrb.mxu0 %v4849_v56  ;;  %v2440_v56 = vsel %vm588_vm4, %v3464_v21, %v3465_v34 }
 0x529   : > { %2715 = vmatpush.msra.mxu2 %v4851_v30  ;;  %v3469_v35 = vunpack.i.l.bf16 %v3468_v44  ;;  %v3470_v37 = vunpack.i.h.bf16 %v3468_v44  ;;  %v2437_v30 = vsel %vm588_vm4, %v3425_v14, %v3509_v23 }
 0x52a   : > { %v4989_v17 = vpop.permute.xlu1 %3497  ;;  %2676 = vmatpush.msrb.mxu0 %v4846_v0  ;;  %v3533_v27 = vpop.permute.xlu2 %3532 }
 0x52b   : > { %2716 = vmatpush.msra.mxu2 %v4868_v15  ;;  %v2397_v0 = vsel %vm557_vm0, %v3504_v55, %v3469_v35  ;;  %v2398_v15 = vsel %vm557_vm0, %v3469_v35, %v3470_v37  ;;  %v3534_v18 = vunpack.i.l.bf16 %v3533_v27  ;;  %v3535_v3 = vunpack.i.h.bf16 %v3533_v27 }
 0x52c   : > { %2677 = vmatpush.msrb.mxu0 %v2439_v45  ;;  %v3500_v7 = vunpack.i.h.bf16 %v4989_v17  ;;  %v3499_v43 = vunpack.i.l.bf16 %v4989_v17 }
 0x52d   : > { %2717 = vmatpush.msra.mxu2 %v2440_v56  ;;  %v2355_v42 = vsel %vm523_vm7, %v3534_v18, %v3449_v5 }
 0x52e   : > { %2678 = vmatpush.msrb.mxu0 %v2437_v30  ;;  %v2320_v39 = vsel %vm504_vm1, %v3499_v43, %v3500_v7 }
 0x52f   : > { %2718 = vmatpush.msra.mxu2 %v2438_v48 }
 0x530   : > { %2679 = vmatpush.msrb.mxu0 %v2397_v0  ;;  %v3483_v25 = vpop.permute.xlu0 %3482 }
 0x531   : > { %2719 = vmatpush.msra.mxu2 %v2398_v15  ;;  %v3485_v63 = vunpack.i.h.bf16 %v3483_v25  ;;  %v3484_v40 = vunpack.i.l.bf16 %v3483_v25 }
 0x532   : > { %v3513_v16 = vpop.permute.xlu1 %3512 }
 0x533   : > { %v3515_v6 = vunpack.i.h.bf16 %v3513_v16  ;;  %v3514_v50 = vunpack.i.l.bf16 %v3513_v16  ;;  %v2353_v13 = vsel %vm523_vm7, %v3535_v3, %v3484_v40  ;;  %v2354_v11 = vsel %vm523_vm7, %v3484_v40, %v3485_v63 }
 0x535   : > { %v2395_v9 = vsel %vm557_vm0, %v3505_v52, %v3514_v50  ;;  %v2396_v28 = vsel %vm557_vm0, %v3514_v50, %v3515_v6  ;;  %vm2754_vm0 = vcmask 1040384  }
 0x536   : > { %2680 = vmatpush.msrb.mxu0 %v2395_v9  ;;  %2720 = vmatpush.msra.mxu2 %v2396_v28 }
 0x538   : > { %2681 = vmatpush.msrb.mxu0 %v2355_v42  ;;  %2721 = vmatpush.msra.mxu2 %v2356_v4  ;;  %v3528_v1 = vpop.permute.xlu0 %3527 }
 0x539   : > { %v3530_v26 = vunpack.i.h.bf16 %v3528_v1  ;;  %v3529_v41 = vunpack.i.l.bf16 %v3528_v1 }
 0x53a   : > { %v3518_v2 = vpop.permute.xlu1 %3517  ;;  %2682 = vmatpush.msrb.mxu0 %v2353_v13  ;;  %2722 = vmatpush.msra.mxu2 %v2354_v11 }
 0x53b   : > { %v3520_v46 = vunpack.i.h.bf16 %v3518_v2  ;;  %v3519_v33 = vunpack.i.l.bf16 %v3518_v2  ;;  %v2318_v62 = vsel %vm504_vm1, %v3529_v41, %v3530_v26 }
 0x53c   : > { %2723 = vmatpush.msra.mxu2 %v2320_v39 }
 0x53d   : > { %v2610_v54 = vsel %vm487_vm5, %v3475_v8, %v3519_v33  ;;  %v2608_v47 = vsel %vm487_vm5, %v3525_v32, %v3520_v46 }
 0x53e   : > { %2724 = vmatpush.msra.mxu2 %v2318_v62  ;;  %2743 = vmatpush.msrb.mxu3 %v2610_v54 }
 0x53f   : > { %2725 = vmatmul.f32.vlgmr.msra.gmra.mxu2 %v2664_v61 }
 0x540   : > { %2744 = vmatpush.msrb.mxu3 %v2608_v47  ;;  %v3538_v51 = vpop.permute.xlu0 %3537 }
 0x541   : > { %v3540_v29 = vunpack.i.h.bf16 %v3538_v51  ;;  %v3539_v19 = vunpack.i.l.bf16 %v3538_v51  ;;  %2914 = vmatmul.msk.f32.vlgmr.msrb.gmra.mxu3 %vm523_vm7, %v2665_v31 }
 0x542   : > { %v2660_v60 = vpop.permute.xlu1 %2659 }
 0x543   : > { %v2319_v57 = vsel %vm504_vm1, %v3539_v19, %v3499_v43  ;;  %v2317_v8 = vsel %vm504_vm1, %v3540_v29, %v3529_v41  ;;  %v2662_v12 = vperm.slane %v2660_v60, 0  ;;  %vm2759_vm1 = vcmp.lt.s32.totalorder %v2757_v53, 256 }
 0x544   : > { %2683 = vmatpush.msrb.mxu0 %v2319_v57 }
 0x546   : > { %2684 = vmatpush.msrb.mxu0 %v2317_v8 }
 0x547   : > { %2685 = vmatmul.f32.vlgmr.msrb.gmra.mxu0 %v2664_v61 }
 0x5aa   : > { %v2706_v20 = vpop.f32.mrf.mxu3 }
 0x5c2   : > { %v2726_v24 = vpop.f32.mrf.mxu2 }
 0x5c3   : > { %v2727_v32 = vadd.f32 %v2726_v24, %v2662_v12 }
 0x5c4   : > { %v2686_v38 = vpop.f32.mrf.mxu0  ;;  %v2746_v58 = vpop.f32.mrf.mxu3 }
 0x5c5   : > { %v2687_v36 = vadd.f32 %v2686_v38, %v2662_v12  ;;  %v2747_v59 = vadd.f32 %v2746_v58, %v2727_v32 }
 0x5c7   : > { %v2707_v31 = vadd.f32 %v2706_v20, %v2687_v36  ;;  %3541 = vtanh.f32 %v2747_v59 }
 0x5c9   : > { %3543 = vtanh.f32 %v2707_v31 }
 0x5cd   : > { %v3542_v21 = vpop.eup %3541 }
 0x5ce   : > { %v2753_v34 = vrot.slane %v3542_v21, 7 }
 0x5cf   : > { %v3544_v44 = vpop.eup %3543 }
 0x5d0   : > { %v2755_v49 = vsel %vm2754_vm0, %v3544_v44, %v2753_v34 }
 0x5d1   : > { %2761 = vst.msk [vmem:[%s443_s18] sm:$0x3] %vm2759_vm1, %v2755_v49 }
 0x5d2   : > { %3679 = shalt.err (!%p3676_p8)
}
 0x5d3   : > { %2940 = dma.vmem_to_hbm [thread:$0]  (%p3847_p5), %s2776_s16, 32, %s2778_s26, %s2763_s10  }
 0x5d4 PF: > { %p2967_p9 = scmp.ge.s32.totalorder %s3726_s22, 2  ;;  %s2789_s21 = sand.u32 1, %s3714_s19  }
 0x5d5   : > { %s2790_s24 = scalar_lea.sflag [#allocation7], %s2789_s21 }
 0x5d6   : > { %p2956_p10 = pnand %p2967_p9, %p3851_p6 }
 0x5d8   : > { %p2957_p11 = pneg %p2956_p10 }
 0x5da   : > { %3709 = dma.done.wait (%p2957_p11), %s2790_s24, 32  }
 0x5db   : > { %3711 = vsyncadd (%p2957_p11), %s2790_s24, 4294967264  ;;  %s5084_s22 = sld [smem:[#allocation19_spill]]  ;;  %s5087_s19 = smov %s3718_s20 }
 0x5dc   : > { %s5085_s27 = sld [smem:[#allocation18_spill]] }
 0x5dd   : > { %s5086_s21 = sld [smem:[#allocation20_spill]] }
 0x5e1   : > { %p26_p12 = scmp.ge.s32.totalorder %s5084_s22, 4  }
 0x5e2   : > { %s5088_s20 = smov %s5085_s27 }
 0x5e3   :  { %28 = sbr.rel (!%p26_p12) target bundleno = 9 (0x9), region = 118 }
 0x5e8   :  { %2796 = vsyncpa [#allocation6], 1 }
 0x5e9   :  { %2798 = vsyncpa [#allocation6 + $0x1], 1 }
 0x5ea   :  { %2799 = vsyncpa [#allocation11], 1 }
 0x5eb   :  { %2800 = vsyncpa [#allocation7], 1 }
 0x5ec   :  { %2802 = vsyncpa [#allocation7 + $0x1], 1 }
 0x5ed   :  { %2803 = vsyncpa [#allocation8], 1 }
 0x5ee   :  { %2805 = vsyncpa [#allocation8 + $0x1], 1 }

</bundles_post_ra>
